<compile_context>
chip_gen: v7x
topology: tpu7x:2x2x1
jax: 0.10.0
libtpu: 0.0.40
codegen_flags: <defaults>
</compile_context>

<pallas_src>
import functools

import numpy as np
import jax
import jax.numpy as jnp
from jax.experimental import pallas as pl
from jax.experimental.pallas import tpu as pltpu


# -----------------------------------------------------------------------------
# Host-side helpers (BN folding + channel padding; no heavy work)
# -----------------------------------------------------------------------------
def _fold_bn(gamma, beta, mean, var, eps=1e-5):
    scale = gamma / jnp.sqrt(var + eps)
    shift = beta - mean * scale
    return scale, shift


def _bn_init(key, c):
    k1, k2, k3, k4 = jax.random.split(key, 4)
    gamma = 1.0 + 0.1 * jax.random.normal(k1, (c,), jnp.float32)
    beta = 0.1 * jax.random.normal(k2, (c,), jnp.float32)
    mean = 0.1 * jax.random.normal(k3, (c,), jnp.float32)
    var = 0.5 + jax.random.uniform(k4, (c,), jnp.float32)
    return _fold_bn(gamma, beta, mean, var)


def init_params(key, cin, cout):
    """Synthetic eval-mode parameters (raw, un-folded)."""
    ks = jax.random.split(key, 7)
    sg, bg = _bn_init(ks[0], cin)                                        # self.norm
    w1 = 0.1 * jax.random.normal(ks[1], (cin, cin), jnp.float32)         # conv1 (1x1)
    s1, b1 = _bn_init(ks[2], cin)                                        # conv1 BN
    w3 = 0.1 * jax.random.normal(ks[3], (cout, cin, 3, 3), jnp.float32)  # RepConvN 3x3
    s3, b3 = _bn_init(ks[4], cout)
    w11 = 0.1 * jax.random.normal(ks[5], (cout, cin), jnp.float32)       # RepConvN 1x1
    s1c, b1c = _bn_init(ks[6], cout)
    return dict(sg=sg, bg=bg, w1=w1, s1=s1, b1=b1,
                w3=w3, s3=s3, b3=b3, w11=w11, s1c=s1c, b1c=b1c)


def fold_params(raw, cin, cout, cp):
    """Fold BN + 1x1 convs; pad channels to `cp` (zeros in the pad slots)."""
    # Context branch folded to one affine map:  ctx = relu(A @ gap(x) + c)
    sw1 = raw["s1"][:, None] * raw["w1"]
    A = sw1 * raw["sg"][None, :]                                         # (cin, cin)
    c = sw1 @ raw["bg"][:, None] + raw["b1"][:, None]                    # (cin, 1)
    A_p = jnp.zeros((cp, cp), jnp.float32).at[:cin, :cin].set(A)
    c_p = jnp.zeros((cp, 1), jnp.float32).at[:cin].set(c)

    # RepConvN folded to one (cout, 9*cp) matmul + bias (tap-major K layout).
    w3f = (raw["s3"][:, None, None, None] * raw["w3"]).transpose(0, 2, 3, 1)
    wc = jnp.zeros((cout, 9, cp), jnp.float32)
    wc = wc.at[:, :, :cin].set(w3f.reshape(cout, 9, cin))
    wc = wc.at[:, 4, :cin].add(raw["s1c"][:, None] * raw["w11"])         # 1x1 -> centre tap
    wc = wc.reshape(cout, 9 * cp).astype(jnp.bfloat16)                   # bf16 MXU operand
    bc = (raw["b3"] + raw["b1c"])[:, None].astype(jnp.float32)           # (cout, 1)
    return dict(A=A_p, c=c_p, wc=wc, bc=bc)


def _pick_num_steps(n):
    """2 grid steps on v7x (2 TensorCores/chip); 1 fat step on single-TC chips."""
    try:
        kind = jax.devices()[0].device_kind.lower()
    except Exception:
        kind = ""
    if ("v7" in kind or "tpu7" in kind) and n % 2 == 0:
        return 2
    return 1


# -----------------------------------------------------------------------------
# The single fused kernel
# -----------------------------------------------------------------------------
def _context_embedding_kernel(H, W, K, x_ref, a_ref, c_ref, w_ref, b_ref,
                              o_ref, im_ref):
    hw = H * W
    cp = a_ref.shape[0]
    inv_hw = 1.0 / hw

    # Per-position (h, w) indices within one image, built in-kernel (cheap VPU
    # filler; no HBM mask DMA).  Power-of-two fast path uses shifts/ands.
    lane = jax.lax.broadcasted_iota(jnp.int32, (1, hw), 1)
    if (W & (W - 1)) == 0:
        h = lane >> (W.bit_length() - 1)
        w = lane & (W - 1)
    else:  # generic fallback
        h = lane // W
        w = lane - h * W

    for k in range(K):                                   # static unroll over images
        seg = pl.ds(k * hw, hw)
        xk = x_ref[:, seg].astype(jnp.float32)           # (Cp, HW) f32

        # Context branch: per-image GAP first, THEN the folded affine + ReLU.
        s = jnp.sum(xk, axis=1, keepdims=True) * inv_hw  # (Cp, 1)
        ctx = jnp.maximum(
            jnp.dot(a_ref[...], s, preferred_element_type=jnp.float32) + c_ref[...],
            0.0)                                         # (Cp, 1)
        # StochasticDepth(p=0.1, mode='row') is the identity at inference.
        xc = xk + ctx                                    # residual add, (Cp, HW) f32

        # RepConvN im2col: 9 shifted taps via roll + boundary mask, stored
        # straight into the bf16 scratch rows (cast fused per tap, no concat).
        for ky in range(3):
            for kx in range(3):
                dy, dx = ky - 1, kx - 1
                rows = pl.ds((ky * 3 + kx) * cp, cp)
                if dy == 0 and dx == 0:
                    im_ref[rows, seg] = xc.astype(im_ref.dtype)
                else:
                    rolled = pltpu.roll(xc, (-(dy * W + dx)) % hw, axis=1)
                    ok = ((h + dy >= 0) & (h + dy < H) &
                          (w + dx >= 0) & (w + dx < W))  # (1, HW) bool
                    im_ref[rows, seg] = jnp.where(ok, rolled, 0.0).astype(im_ref.dtype)

    # RepConvN 3x3 + 1x1 branches as ONE bf16 matmul over all K*HW lanes.
    out = jnp.dot(w_ref[...], im_ref[...],
                  preferred_element_type=jnp.float32) + b_ref[...]       # (Cout, K*HW)
    o_ref[...] = jnp.maximum(out, 0.0).astype(o_ref.dtype)


def context_embedding_forward(x, folded, *, num_steps=None, out_dtype=jnp.float32):
    N, Cin, H, W = x.shape
    HW = H * W
    cp = folded["A"].shape[0]
    Cout = folded["wc"].shape[0]
    if num_steps is None:
        num_steps = _pick_num_steps(N)
    assert N % num_steps == 0
    K = N // num_steps
    L = K * HW

    # Fold batch into the lane axis and pad channels to the packed-tile size.
    x2 = x.reshape(N, Cin, HW).transpose(1, 0, 2).reshape(Cin, N * HW)
    if cp > Cin:
        x2 = jnp.pad(x2, ((0, cp - Cin), (0, 0)))

    out2 = pl.pallas_call(
        functools.partial(_context_embedding_kernel, H, W, K),
        out_shape=jax.ShapeDtypeStruct((Cout, N * HW), out_dtype),
        grid=(num_steps,),
        in_specs=[
            pl.BlockSpec((cp, L), lambda i: (0, i)),          # x  (batch in lanes)
            pl.BlockSpec((cp, cp), lambda i: (0, 0)),         # A  (folded ctx matrix)
            pl.BlockSpec((cp, 1), lambda i: (0, 0)),          # c  (folded ctx bias)
            pl.BlockSpec((Cout, 9 * cp), lambda i: (0, 0)),   # wc (bf16 conv weights)
            pl.BlockSpec((Cout, 1), lambda i: (0, 0)),        # bc (conv bias)
        ],
        out_specs=pl.BlockSpec((Cout, L), lambda i: (0, i)),
        scratch_shapes=[pltpu.VMEM((9 * cp, L), jnp.bfloat16)],   # im2col slab
        compiler_params=pltpu.CompilerParams(dimension_semantics=("parallel",)),
    )(x2, folded["A"], folded["c"], folded["wc"], folded["bc"])

    return out2.reshape(Cout, N, HW).transpose(1, 0, 2).reshape(N, Cout, H, W)


# -----------------------------------------------------------------------------
# Pure-JAX reference (f32) for correctness check
# -----------------------------------------------------------------------------
def reference_forward(x, raw):
    def bcast(v):
        return v[None, :, None, None]
    gap = jnp.mean(x, axis=(2, 3), keepdims=True)                        # (N,C,1,1)
    v = gap * bcast(raw["sg"]) + bcast(raw["bg"])                        # BN eval
    u = jnp.einsum("oc,nchw->nohw", raw["w1"], v,
                   precision=jax.lax.Precision.HIGHEST)                  # 1x1 conv
    u = jnp.maximum(u * bcast(raw["s1"]) + bcast(raw["b1"]), 0.0)        # BN + ReLU
    xc = x + u                                                           # residual (drop = id)
    y3 = jax.lax.conv_general_dilated(
        xc, raw["w3"], window_strides=(1, 1), padding=((1, 1), (1, 1)),
        dimension_numbers=("NCHW", "OIHW", "NCHW"),
        precision=jax.lax.Precision.HIGHEST)
    y3 = y3 * bcast(raw["s3"]) + bcast(raw["b3"])
    y1 = jnp.einsum("oc,nchw->nohw", raw["w11"], xc,
                    precision=jax.lax.Precision.HIGHEST)
    y1 = y1 * bcast(raw["s1c"]) + bcast(raw["b1c"])
    return jnp.maximum(y3 + y1, 0.0)


if __name__ == "__main__":
    key = jax.random.PRNGKey(0)
    kx, kp = jax.random.split(key)
    N, Cin, Cout, H, W = 2, 8, 16, 16, 16

    x = jax.random.normal(kx, (N, Cin, H, W), jnp.float32)
    raw = init_params(kp, Cin, Cout)

    cp = -(-Cin // 16) * 16          # pad channels to the bf16 packed sublane tile
    folded = fold_params(raw, Cin, Cout, cp)

    out = jax.block_until_ready(context_embedding_forward(x, folded))
    assert out.shape == (N, Cout, H, W), out.shape
    assert bool(jnp.all(jnp.isfinite(out)))

    ref = jax.block_until_ready(reference_forward(x, raw))
    np.testing.assert_allclose(np.asarray(out), np.asarray(ref), rtol=5e-2, atol=1e-1)

    print("KERNEL_OK")
</pallas_src>

<mosaic_0001>
module attributes {stable_mosaic.version = 11 : i64} {
  func.func @_context_embedding_kernel(%arg0: i32, %arg1: memref<16x512xf32, #tpu.memory_space<vmem>>, %arg2: memref<16x16xf32, #tpu.memory_space<vmem>>, %arg3: memref<16x1xf32, #tpu.memory_space<vmem>>, %arg4: memref<16x144xbf16, #tpu.memory_space<vmem>>, %arg5: memref<16x1xf32, #tpu.memory_space<vmem>>, %arg6: memref<16x512xf32, #tpu.memory_space<vmem>>, %arg7: memref<144x512xbf16, #tpu.memory_space<vmem>>) attributes {dimension_semantics = [#tpu.dimension_semantics<parallel>], iteration_bounds = array<i64: 1>, scalar_prefetch = 0 : i64, scratch_operands = 1 : i64, tpu.core_type = #tpu.core_type<tc>, window_params = [{transform_indices = @transform_0, window_bounds = array<i64: 16, 512>}, {pipeline_mode = #tpu.pipeline_mode<synchronous>, transform_indices = @transform_1, window_bounds = array<i64: 16, 16>}, {pipeline_mode = #tpu.pipeline_mode<synchronous>, transform_indices = @transform_2, window_bounds = array<i64: 16, 1>}, {pipeline_mode = #tpu.pipeline_mode<synchronous>, transform_indices = @transform_3, window_bounds = array<i64: 16, 144>}, {pipeline_mode = #tpu.pipeline_mode<synchronous>, transform_indices = @transform_4, window_bounds = array<i64: 16, 1>}, {transform_indices = @transform_5, window_bounds = array<i64: 16, 512>}]} {
    %0 = tpu.iota {dimensions = array<i32: 1>} : vector<1x256xi32>
    %c4_i32 = arith.constant 4 : i32
    %1 = vector.broadcast %c4_i32 : i32 to vector<1x256xi32>
    %2 = arith.shrsi %0, %1 : vector<1x256xi32>
    %c15_i32 = arith.constant 15 : i32
    %3 = vector.broadcast %c15_i32 : i32 to vector<1x256xi32>
    %4 = arith.andi %0, %3 : vector<1x256xi32>
    %c0 = arith.constant 0 : index
    %c0_0 = arith.constant 0 : index
    %5 = vector.load %arg1[%c0, %c0_0] : memref<16x512xf32, #tpu.memory_space<vmem>>, vector<16x256xf32>
    %cst = arith.constant dense<0.000000e+00> : vector<16xf32>
    %6 = vector.multi_reduction <add>, %5, %cst [1] : vector<16x256xf32> to vector<16xf32>
    %7 = vector.shape_cast %6 : vector<16xf32> to vector<16x1xf32>
    %cst_1 = arith.constant 3.906250e-03 : f32
    %8 = vector.broadcast %cst_1 : f32 to vector<16x1xf32>
    %9 = arith.mulf %7, %8 : vector<16x1xf32>
    %c0_2 = arith.constant 0 : index
    %c0_3 = arith.constant 0 : index
    %10 = vector.load %arg2[%c0_2, %c0_3] : memref<16x16xf32, #tpu.memory_space<vmem>>, vector<16x16xf32>
    %cst_4 = arith.constant dense<0.000000e+00> : vector<16x1xf32>
    %11 = tpu.matmul %10, %9, %cst_4 {dimension_numbers = #tpu.dot_dimension_numbers<[1], [0], [0], [1], [0, 0, 1, 1], [], []>} : vector<16x16xf32>, vector<16x1xf32>, vector<16x1xf32> -> vector<16x1xf32>
    %c0_5 = arith.constant 0 : index
    %c0_6 = arith.constant 0 : index
    %12 = vector.load %arg3[%c0_5, %c0_6] : memref<16x1xf32, #tpu.memory_space<vmem>>, vector<16x1xf32>
    %13 = arith.addf %11, %12 : vector<16x1xf32>
    %cst_7 = arith.constant 0.000000e+00 : f32
    %14 = vector.broadcast %cst_7 : f32 to vector<16x1xf32>
    %15 = arith.maximumf %13, %14 : vector<16x1xf32>
    %16 = vector.broadcast %15 : vector<16x1xf32> to vector<16x256xf32>
    %17 = arith.addf %5, %16 : vector<16x256xf32>
    %c17_i32 = arith.constant 17 : i32
    %18 = tpu.dynamic_rotate %17 by %c17_i32 dim 1 : vector<16x256xf32>, i32 -> vector<16x256xf32>
    %c-1_i32 = arith.constant -1 : i32
    %19 = vector.broadcast %c-1_i32 : i32 to vector<1x256xi32>
    %20 = arith.addi %2, %19 : vector<1x256xi32>
    %c0_i32 = arith.constant 0 : i32
    %21 = vector.broadcast %c0_i32 : i32 to vector<1x256xi32>
    %22 = arith.cmpi sge, %20, %21 : vector<1x256xi32>
    %c-1_i32_8 = arith.constant -1 : i32
    %23 = vector.broadcast %c-1_i32_8 : i32 to vector<1x256xi32>
    %24 = arith.addi %2, %23 : vector<1x256xi32>
    %c16_i32 = arith.constant 16 : i32
    %25 = vector.broadcast %c16_i32 : i32 to vector<1x256xi32>
    %26 = arith.cmpi slt, %24, %25 : vector<1x256xi32>
    %27 = arith.andi %22, %26 : vector<1x256xi1>
    %c-1_i32_9 = arith.constant -1 : i32
    %28 = vector.broadcast %c-1_i32_9 : i32 to vector<1x256xi32>
    %29 = arith.addi %4, %28 : vector<1x256xi32>
    %c0_i32_10 = arith.constant 0 : i32
    %30 = vector.broadcast %c0_i32_10 : i32 to vector<1x256xi32>
    %31 = arith.cmpi sge, %29, %30 : vector<1x256xi32>
    %32 = arith.andi %27, %31 : vector<1x256xi1>
    %c-1_i32_11 = arith.constant -1 : i32
    %33 = vector.broadcast %c-1_i32_11 : i32 to vector<1x256xi32>
    %34 = arith.addi %4, %33 : vector<1x256xi32>
    %c16_i32_12 = arith.constant 16 : i32
    %35 = vector.broadcast %c16_i32_12 : i32 to vector<1x256xi32>
    %36 = arith.cmpi slt, %34, %35 : vector<1x256xi32>
    %37 = arith.andi %32, %36 : vector<1x256xi1>
    %cst_13 = arith.constant 0.000000e+00 : f32
    %38 = vector.shape_cast %37 : vector<1x256xi1> to vector<1x256xi1>
    %39 = vector.broadcast %38 : vector<1x256xi1> to vector<16x256xi1>
    %40 = vector.broadcast %cst_13 : f32 to vector<16x256xf32>
    %41 = arith.select %39, %18, %40 : vector<16x256xi1>, vector<16x256xf32>
    %42 = arith.truncf %41 : vector<16x256xf32> to vector<16x256xbf16>
    %c0_14 = arith.constant 0 : index
    %c0_15 = arith.constant 0 : index
    %43 = vector.load %arg7[%c0_14, %c0_15] : memref<144x512xbf16, #tpu.memory_space<vmem>>, vector<16x256xbf16>
    tpu.vector_store %arg7[%c0_14, %c0_15], %42 {strides = array<i32>} : memref<144x512xbf16, #tpu.memory_space<vmem>>, vector<16x256xbf16>,
    %c16_i32_16 = arith.constant 16 : i32
    %44 = tpu.dynamic_rotate %17 by %c16_i32_16 dim 1 : vector<16x256xf32>, i32 -> vector<16x256xf32>
    %c-1_i32_17 = arith.constant -1 : i32
    %45 = vector.broadcast %c-1_i32_17 : i32 to vector<1x256xi32>
    %46 = arith.addi %2, %45 : vector<1x256xi32>
    %c0_i32_18 = arith.constant 0 : i32
    %47 = vector.broadcast %c0_i32_18 : i32 to vector<1x256xi32>
    %48 = arith.cmpi sge, %46, %47 : vector<1x256xi32>
    %c-1_i32_19 = arith.constant -1 : i32
    %49 = vector.broadcast %c-1_i32_19 : i32 to vector<1x256xi32>
    %50 = arith.addi %2, %49 : vector<1x256xi32>
    %c16_i32_20 = arith.constant 16 : i32
    %51 = vector.broadcast %c16_i32_20 : i32 to vector<1x256xi32>
    %52 = arith.cmpi slt, %50, %51 : vector<1x256xi32>
    %53 = arith.andi %48, %52 : vector<1x256xi1>
    %c0_i32_21 = arith.constant 0 : i32
    %54 = vector.broadcast %c0_i32_21 : i32 to vector<1x256xi32>
    %55 = arith.addi %4, %54 : vector<1x256xi32>
    %c0_i32_22 = arith.constant 0 : i32
    %56 = vector.broadcast %c0_i32_22 : i32 to vector<1x256xi32>
    %57 = arith.cmpi sge, %55, %56 : vector<1x256xi32>
    %58 = arith.andi %53, %57 : vector<1x256xi1>
    %c0_i32_23 = arith.constant 0 : i32
    %59 = vector.broadcast %c0_i32_23 : i32 to vector<1x256xi32>
    %60 = arith.addi %4, %59 : vector<1x256xi32>
    %c16_i32_24 = arith.constant 16 : i32
    %61 = vector.broadcast %c16_i32_24 : i32 to vector<1x256xi32>
    %62 = arith.cmpi slt, %60, %61 : vector<1x256xi32>
    %63 = arith.andi %58, %62 : vector<1x256xi1>
    %cst_25 = arith.constant 0.000000e+00 : f32
    %64 = vector.shape_cast %63 : vector<1x256xi1> to vector<1x256xi1>
    %65 = vector.broadcast %64 : vector<1x256xi1> to vector<16x256xi1>
    %66 = vector.broadcast %cst_25 : f32 to vector<16x256xf32>
    %67 = arith.select %65, %44, %66 : vector<16x256xi1>, vector<16x256xf32>
    %68 = arith.truncf %67 : vector<16x256xf32> to vector<16x256xbf16>
    %c16 = arith.constant 16 : index
    %c0_26 = arith.constant 0 : index
    %69 = vector.load %arg7[%c16, %c0_26] : memref<144x512xbf16, #tpu.memory_space<vmem>>, vector<16x256xbf16>
    tpu.vector_store %arg7[%c16, %c0_26], %68 {strides = array<i32>} : memref<144x512xbf16, #tpu.memory_space<vmem>>, vector<16x256xbf16>,
    %c15_i32_27 = arith.constant 15 : i32
    %70 = tpu.dynamic_rotate %17 by %c15_i32_27 dim 1 : vector<16x256xf32>, i32 -> vector<16x256xf32>
    %c-1_i32_28 = arith.constant -1 : i32
    %71 = vector.broadcast %c-1_i32_28 : i32 to vector<1x256xi32>
    %72 = arith.addi %2, %71 : vector<1x256xi32>
    %c0_i32_29 = arith.constant 0 : i32
    %73 = vector.broadcast %c0_i32_29 : i32 to vector<1x256xi32>
    %74 = arith.cmpi sge, %72, %73 : vector<1x256xi32>
    %c-1_i32_30 = arith.constant -1 : i32
    %75 = vector.broadcast %c-1_i32_30 : i32 to vector<1x256xi32>
    %76 = arith.addi %2, %75 : vector<1x256xi32>
    %c16_i32_31 = arith.constant 16 : i32
    %77 = vector.broadcast %c16_i32_31 : i32 to vector<1x256xi32>
    %78 = arith.cmpi slt, %76, %77 : vector<1x256xi32>
    %79 = arith.andi %74, %78 : vector<1x256xi1>
    %c1_i32 = arith.constant 1 : i32
    %80 = vector.broadcast %c1_i32 : i32 to vector<1x256xi32>
    %81 = arith.addi %4, %80 : vector<1x256xi32>
    %c0_i32_32 = arith.constant 0 : i32
    %82 = vector.broadcast %c0_i32_32 : i32 to vector<1x256xi32>
    %83 = arith.cmpi sge, %81, %82 : vector<1x256xi32>
    %84 = arith.andi %79, %83 : vector<1x256xi1>
    %c1_i32_33 = arith.constant 1 : i32
    %85 = vector.broadcast %c1_i32_33 : i32 to vector<1x256xi32>
    %86 = arith.addi %4, %85 : vector<1x256xi32>
    %c16_i32_34 = arith.constant 16 : i32
    %87 = vector.broadcast %c16_i32_34 : i32 to vector<1x256xi32>
    %88 = arith.cmpi slt, %86, %87 : vector<1x256xi32>
    %89 = arith.andi %84, %88 : vector<1x256xi1>
    %cst_35 = arith.constant 0.000000e+00 : f32
    %90 = vector.shape_cast %89 : vector<1x256xi1> to vector<1x256xi1>
    %91 = vector.broadcast %90 : vector<1x256xi1> to vector<16x256xi1>
    %92 = vector.broadcast %cst_35 : f32 to vector<16x256xf32>
    %93 = arith.select %91, %70, %92 : vector<16x256xi1>, vector<16x256xf32>
    %94 = arith.truncf %93 : vector<16x256xf32> to vector<16x256xbf16>
    %c32 = arith.constant 32 : index
    %c0_36 = arith.constant 0 : index
    %95 = vector.load %arg7[%c32, %c0_36] : memref<144x512xbf16, #tpu.memory_space<vmem>>, vector<16x256xbf16>
    tpu.vector_store %arg7[%c32, %c0_36], %94 {strides = array<i32>} : memref<144x512xbf16, #tpu.memory_space<vmem>>, vector<16x256xbf16>,
    %c1_i32_37 = arith.constant 1 : i32
    %96 = tpu.dynamic_rotate %17 by %c1_i32_37 dim 1 : vector<16x256xf32>, i32 -> vector<16x256xf32>
    %c0_i32_38 = arith.constant 0 : i32
    %97 = vector.broadcast %c0_i32_38 : i32 to vector<1x256xi32>
    %98 = arith.addi %2, %97 : vector<1x256xi32>
    %c0_i32_39 = arith.constant 0 : i32
    %99 = vector.broadcast %c0_i32_39 : i32 to vector<1x256xi32>
    %100 = arith.cmpi sge, %98, %99 : vector<1x256xi32>
    %c0_i32_40 = arith.constant 0 : i32
    %101 = vector.broadcast %c0_i32_40 : i32 to vector<1x256xi32>
    %102 = arith.addi %2, %101 : vector<1x256xi32>
    %c16_i32_41 = arith.constant 16 : i32
    %103 = vector.broadcast %c16_i32_41 : i32 to vector<1x256xi32>
    %104 = arith.cmpi slt, %102, %103 : vector<1x256xi32>
    %105 = arith.andi %100, %104 : vector<1x256xi1>
    %c-1_i32_42 = arith.constant -1 : i32
    %106 = vector.broadcast %c-1_i32_42 : i32 to vector<1x256xi32>
    %107 = arith.addi %4, %106 : vector<1x256xi32>
    %c0_i32_43 = arith.constant 0 : i32
    %108 = vector.broadcast %c0_i32_43 : i32 to vector<1x256xi32>
    %109 = arith.cmpi sge, %107, %108 : vector<1x256xi32>
    %110 = arith.andi %105, %109 : vector<1x256xi1>
    %c-1_i32_44 = arith.constant -1 : i32
    %111 = vector.broadcast %c-1_i32_44 : i32 to vector<1x256xi32>
    %112 = arith.addi %4, %111 : vector<1x256xi32>
    %c16_i32_45 = arith.constant 16 : i32
    %113 = vector.broadcast %c16_i32_45 : i32 to vector<1x256xi32>
    %114 = arith.cmpi slt, %112, %113 : vector<1x256xi32>
    %115 = arith.andi %110, %114 : vector<1x256xi1>
    %cst_46 = arith.constant 0.000000e+00 : f32
    %116 = vector.shape_cast %115 : vector<1x256xi1> to vector<1x256xi1>
    %117 = vector.broadcast %116 : vector<1x256xi1> to vector<16x256xi1>
    %118 = vector.broadcast %cst_46 : f32 to vector<16x256xf32>
    %119 = arith.select %117, %96, %118 : vector<16x256xi1>, vector<16x256xf32>
    %120 = arith.truncf %119 : vector<16x256xf32> to vector<16x256xbf16>
    %c48 = arith.constant 48 : index
    %c0_47 = arith.constant 0 : index
    %121 = vector.load %arg7[%c48, %c0_47] : memref<144x512xbf16, #tpu.memory_space<vmem>>, vector<16x256xbf16>
    tpu.vector_store %arg7[%c48, %c0_47], %120 {strides = array<i32>} : memref<144x512xbf16, #tpu.memory_space<vmem>>, vector<16x256xbf16>,
    %122 = arith.truncf %17 : vector<16x256xf32> to vector<16x256xbf16>
    %c64 = arith.constant 64 : index
    %c0_48 = arith.constant 0 : index
    %123 = vector.load %arg7[%c64, %c0_48] : memref<144x512xbf16, #tpu.memory_space<vmem>>, vector<16x256xbf16>
    tpu.vector_store %arg7[%c64, %c0_48], %122 {strides = array<i32>} : memref<144x512xbf16, #tpu.memory_space<vmem>>, vector<16x256xbf16>,
    %c255_i32 = arith.constant 255 : i32
    %124 = tpu.dynamic_rotate %17 by %c255_i32 dim 1 : vector<16x256xf32>, i32 -> vector<16x256xf32>
    %c0_i32_49 = arith.constant 0 : i32
    %125 = vector.broadcast %c0_i32_49 : i32 to vector<1x256xi32>
    %126 = arith.addi %2, %125 : vector<1x256xi32>
    %c0_i32_50 = arith.constant 0 : i32
    %127 = vector.broadcast %c0_i32_50 : i32 to vector<1x256xi32>
    %128 = arith.cmpi sge, %126, %127 : vector<1x256xi32>
    %c0_i32_51 = arith.constant 0 : i32
    %129 = vector.broadcast %c0_i32_51 : i32 to vector<1x256xi32>
    %130 = arith.addi %2, %129 : vector<1x256xi32>
    %c16_i32_52 = arith.constant 16 : i32
    %131 = vector.broadcast %c16_i32_52 : i32 to vector<1x256xi32>
    %132 = arith.cmpi slt, %130, %131 : vector<1x256xi32>
    %133 = arith.andi %128, %132 : vector<1x256xi1>
    %c1_i32_53 = arith.constant 1 : i32
    %134 = vector.broadcast %c1_i32_53 : i32 to vector<1x256xi32>
    %135 = arith.addi %4, %134 : vector<1x256xi32>
    %c0_i32_54 = arith.constant 0 : i32
    %136 = vector.broadcast %c0_i32_54 : i32 to vector<1x256xi32>
    %137 = arith.cmpi sge, %135, %136 : vector<1x256xi32>
    %138 = arith.andi %133, %137 : vector<1x256xi1>
    %c1_i32_55 = arith.constant 1 : i32
    %139 = vector.broadcast %c1_i32_55 : i32 to vector<1x256xi32>
    %140 = arith.addi %4, %139 : vector<1x256xi32>
    %c16_i32_56 = arith.constant 16 : i32
    %141 = vector.broadcast %c16_i32_56 : i32 to vector<1x256xi32>
    %142 = arith.cmpi slt, %140, %141 : vector<1x256xi32>
    %143 = arith.andi %138, %142 : vector<1x256xi1>
    %cst_57 = arith.constant 0.000000e+00 : f32
    %144 = vector.shape_cast %143 : vector<1x256xi1> to vector<1x256xi1>
    %145 = vector.broadcast %144 : vector<1x256xi1> to vector<16x256xi1>
    %146 = vector.broadcast %cst_57 : f32 to vector<16x256xf32>
    %147 = arith.select %145, %124, %146 : vector<16x256xi1>, vector<16x256xf32>
    %148 = arith.truncf %147 : vector<16x256xf32> to vector<16x256xbf16>
    %c80 = arith.constant 80 : index
    %c0_58 = arith.constant 0 : index
    %149 = vector.load %arg7[%c80, %c0_58] : memref<144x512xbf16, #tpu.memory_space<vmem>>, vector<16x256xbf16>
    tpu.vector_store %arg7[%c80, %c0_58], %148 {strides = array<i32>} : memref<144x512xbf16, #tpu.memory_space<vmem>>, vector<16x256xbf16>,
    %c241_i32 = arith.constant 241 : i32
    %150 = tpu.dynamic_rotate %17 by %c241_i32 dim 1 : vector<16x256xf32>, i32 -> vector<16x256xf32>
    %c1_i32_59 = arith.constant 1 : i32
    %151 = vector.broadcast %c1_i32_59 : i32 to vector<1x256xi32>
    %152 = arith.addi %2, %151 : vector<1x256xi32>
    %c0_i32_60 = arith.constant 0 : i32
    %153 = vector.broadcast %c0_i32_60 : i32 to vector<1x256xi32>
    %154 = arith.cmpi sge, %152, %153 : vector<1x256xi32>
    %c1_i32_61 = arith.constant 1 : i32
    %155 = vector.broadcast %c1_i32_61 : i32 to vector<1x256xi32>
    %156 = arith.addi %2, %155 : vector<1x256xi32>
    %c16_i32_62 = arith.constant 16 : i32
    %157 = vector.broadcast %c16_i32_62 : i32 to vector<1x256xi32>
    %158 = arith.cmpi slt, %156, %157 : vector<1x256xi32>
    %159 = arith.andi %154, %158 : vector<1x256xi1>
    %c-1_i32_63 = arith.constant -1 : i32
    %160 = vector.broadcast %c-1_i32_63 : i32 to vector<1x256xi32>
    %161 = arith.addi %4, %160 : vector<1x256xi32>
    %c0_i32_64 = arith.constant 0 : i32
    %162 = vector.broadcast %c0_i32_64 : i32 to vector<1x256xi32>
    %163 = arith.cmpi sge, %161, %162 : vector<1x256xi32>
    %164 = arith.andi %159, %163 : vector<1x256xi1>
    %c-1_i32_65 = arith.constant -1 : i32
    %165 = vector.broadcast %c-1_i32_65 : i32 to vector<1x256xi32>
    %166 = arith.addi %4, %165 : vector<1x256xi32>
    %c16_i32_66 = arith.constant 16 : i32
    %167 = vector.broadcast %c16_i32_66 : i32 to vector<1x256xi32>
    %168 = arith.cmpi slt, %166, %167 : vector<1x256xi32>
    %169 = arith.andi %164, %168 : vector<1x256xi1>
    %cst_67 = arith.constant 0.000000e+00 : f32
    %170 = vector.shape_cast %169 : vector<1x256xi1> to vector<1x256xi1>
    %171 = vector.broadcast %170 : vector<1x256xi1> to vector<16x256xi1>
    %172 = vector.broadcast %cst_67 : f32 to vector<16x256xf32>
    %173 = arith.select %171, %150, %172 : vector<16x256xi1>, vector<16x256xf32>
    %174 = arith.truncf %173 : vector<16x256xf32> to vector<16x256xbf16>
    %c96 = arith.constant 96 : index
    %c0_68 = arith.constant 0 : index
    %175 = vector.load %arg7[%c96, %c0_68] : memref<144x512xbf16, #tpu.memory_space<vmem>>, vector<16x256xbf16>
    tpu.vector_store %arg7[%c96, %c0_68], %174 {strides = array<i32>} : memref<144x512xbf16, #tpu.memory_space<vmem>>, vector<16x256xbf16>,
    %c240_i32 = arith.constant 240 : i32
    %176 = tpu.dynamic_rotate %17 by %c240_i32 dim 1 : vector<16x256xf32>, i32 -> vector<16x256xf32>
    %c1_i32_69 = arith.constant 1 : i32
    %177 = vector.broadcast %c1_i32_69 : i32 to vector<1x256xi32>
    %178 = arith.addi %2, %177 : vector<1x256xi32>
    %c0_i32_70 = arith.constant 0 : i32
    %179 = vector.broadcast %c0_i32_70 : i32 to vector<1x256xi32>
    %180 = arith.cmpi sge, %178, %179 : vector<1x256xi32>
    %c1_i32_71 = arith.constant 1 : i32
    %181 = vector.broadcast %c1_i32_71 : i32 to vector<1x256xi32>
    %182 = arith.addi %2, %181 : vector<1x256xi32>
    %c16_i32_72 = arith.constant 16 : i32
    %183 = vector.broadcast %c16_i32_72 : i32 to vector<1x256xi32>
    %184 = arith.cmpi slt, %182, %183 : vector<1x256xi32>
    %185 = arith.andi %180, %184 : vector<1x256xi1>
    %c0_i32_73 = arith.constant 0 : i32
    %186 = vector.broadcast %c0_i32_73 : i32 to vector<1x256xi32>
    %187 = arith.addi %4, %186 : vector<1x256xi32>
    %c0_i32_74 = arith.constant 0 : i32
    %188 = vector.broadcast %c0_i32_74 : i32 to vector<1x256xi32>
    %189 = arith.cmpi sge, %187, %188 : vector<1x256xi32>
    %190 = arith.andi %185, %189 : vector<1x256xi1>
    %c0_i32_75 = arith.constant 0 : i32
    %191 = vector.broadcast %c0_i32_75 : i32 to vector<1x256xi32>
    %192 = arith.addi %4, %191 : vector<1x256xi32>
    %c16_i32_76 = arith.constant 16 : i32
    %193 = vector.broadcast %c16_i32_76 : i32 to vector<1x256xi32>
    %194 = arith.cmpi slt, %192, %193 : vector<1x256xi32>
    %195 = arith.andi %190, %194 : vector<1x256xi1>
    %cst_77 = arith.constant 0.000000e+00 : f32
    %196 = vector.shape_cast %195 : vector<1x256xi1> to vector<1x256xi1>
    %197 = vector.broadcast %196 : vector<1x256xi1> to vector<16x256xi1>
    %198 = vector.broadcast %cst_77 : f32 to vector<16x256xf32>
    %199 = arith.select %197, %176, %198 : vector<16x256xi1>, vector<16x256xf32>
    %200 = arith.truncf %199 : vector<16x256xf32> to vector<16x256xbf16>
    %c112 = arith.constant 112 : index
    %c0_78 = arith.constant 0 : index
    %201 = vector.load %arg7[%c112, %c0_78] : memref<144x512xbf16, #tpu.memory_space<vmem>>, vector<16x256xbf16>
    tpu.vector_store %arg7[%c112, %c0_78], %200 {strides = array<i32>} : memref<144x512xbf16, #tpu.memory_space<vmem>>, vector<16x256xbf16>,
    %c239_i32 = arith.constant 239 : i32
    %202 = tpu.dynamic_rotate %17 by %c239_i32 dim 1 : vector<16x256xf32>, i32 -> vector<16x256xf32>
    %c1_i32_79 = arith.constant 1 : i32
    %203 = vector.broadcast %c1_i32_79 : i32 to vector<1x256xi32>
    %204 = arith.addi %2, %203 : vector<1x256xi32>
    %c0_i32_80 = arith.constant 0 : i32
    %205 = vector.broadcast %c0_i32_80 : i32 to vector<1x256xi32>
    %206 = arith.cmpi sge, %204, %205 : vector<1x256xi32>
    %c1_i32_81 = arith.constant 1 : i32
    %207 = vector.broadcast %c1_i32_81 : i32 to vector<1x256xi32>
    %208 = arith.addi %2, %207 : vector<1x256xi32>
    %c16_i32_82 = arith.constant 16 : i32
    %209 = vector.broadcast %c16_i32_82 : i32 to vector<1x256xi32>
    %210 = arith.cmpi slt, %208, %209 : vector<1x256xi32>
    %211 = arith.andi %206, %210 : vector<1x256xi1>
    %c1_i32_83 = arith.constant 1 : i32
    %212 = vector.broadcast %c1_i32_83 : i32 to vector<1x256xi32>
    %213 = arith.addi %4, %212 : vector<1x256xi32>
    %c0_i32_84 = arith.constant 0 : i32
    %214 = vector.broadcast %c0_i32_84 : i32 to vector<1x256xi32>
    %215 = arith.cmpi sge, %213, %214 : vector<1x256xi32>
    %216 = arith.andi %211, %215 : vector<1x256xi1>
    %c1_i32_85 = arith.constant 1 : i32
    %217 = vector.broadcast %c1_i32_85 : i32 to vector<1x256xi32>
    %218 = arith.addi %4, %217 : vector<1x256xi32>
    %c16_i32_86 = arith.constant 16 : i32
    %219 = vector.broadcast %c16_i32_86 : i32 to vector<1x256xi32>
    %220 = arith.cmpi slt, %218, %219 : vector<1x256xi32>
    %221 = arith.andi %216, %220 : vector<1x256xi1>
    %cst_87 = arith.constant 0.000000e+00 : f32
    %222 = vector.shape_cast %221 : vector<1x256xi1> to vector<1x256xi1>
    %223 = vector.broadcast %222 : vector<1x256xi1> to vector<16x256xi1>
    %224 = vector.broadcast %cst_87 : f32 to vector<16x256xf32>
    %225 = arith.select %223, %202, %224 : vector<16x256xi1>, vector<16x256xf32>
    %226 = arith.truncf %225 : vector<16x256xf32> to vector<16x256xbf16>
    %c128 = arith.constant 128 : index
    %c0_88 = arith.constant 0 : index
    %227 = vector.load %arg7[%c128, %c0_88] : memref<144x512xbf16, #tpu.memory_space<vmem>>, vector<16x256xbf16>
    tpu.vector_store %arg7[%c128, %c0_88], %226 {strides = array<i32>} : memref<144x512xbf16, #tpu.memory_space<vmem>>, vector<16x256xbf16>,
    %c0_89 = arith.constant 0 : index
    %c256 = arith.constant 256 : index
    %228 = vector.load %arg1[%c0_89, %c256] : memref<16x512xf32, #tpu.memory_space<vmem>>, vector<16x256xf32>
    %cst_90 = arith.constant dense<0.000000e+00> : vector<16xf32>
    %229 = vector.multi_reduction <add>, %228, %cst_90 [1] : vector<16x256xf32> to vector<16xf32>
    %230 = vector.shape_cast %229 : vector<16xf32> to vector<16x1xf32>
    %cst_91 = arith.constant 3.906250e-03 : f32
    %231 = vector.broadcast %cst_91 : f32 to vector<16x1xf32>
    %232 = arith.mulf %230, %231 : vector<16x1xf32>
    %c0_92 = arith.constant 0 : index
    %c0_93 = arith.constant 0 : index
    %233 = vector.load %arg2[%c0_92, %c0_93] : memref<16x16xf32, #tpu.memory_space<vmem>>, vector<16x16xf32>
    %cst_94 = arith.constant dense<0.000000e+00> : vector<16x1xf32>
    %234 = tpu.matmul %233, %232, %cst_94 {dimension_numbers = #tpu.dot_dimension_numbers<[1], [0], [0], [1], [0, 0, 1, 1], [], []>} : vector<16x16xf32>, vector<16x1xf32>, vector<16x1xf32> -> vector<16x1xf32>
    %c0_95 = arith.constant 0 : index
    %c0_96 = arith.constant 0 : index
    %235 = vector.load %arg3[%c0_95, %c0_96] : memref<16x1xf32, #tpu.memory_space<vmem>>, vector<16x1xf32>
    %236 = arith.addf %234, %235 : vector<16x1xf32>
    %cst_97 = arith.constant 0.000000e+00 : f32
    %237 = vector.broadcast %cst_97 : f32 to vector<16x1xf32>
    %238 = arith.maximumf %236, %237 : vector<16x1xf32>
    %239 = vector.broadcast %238 : vector<16x1xf32> to vector<16x256xf32>
    %240 = arith.addf %228, %239 : vector<16x256xf32>
    %c17_i32_98 = arith.constant 17 : i32
    %241 = tpu.dynamic_rotate %240 by %c17_i32_98 dim 1 : vector<16x256xf32>, i32 -> vector<16x256xf32>
    %c-1_i32_99 = arith.constant -1 : i32
    %242 = vector.broadcast %c-1_i32_99 : i32 to vector<1x256xi32>
    %243 = arith.addi %2, %242 : vector<1x256xi32>
    %c0_i32_100 = arith.constant 0 : i32
    %244 = vector.broadcast %c0_i32_100 : i32 to vector<1x256xi32>
    %245 = arith.cmpi sge, %243, %244 : vector<1x256xi32>
    %c-1_i32_101 = arith.constant -1 : i32
    %246 = vector.broadcast %c-1_i32_101 : i32 to vector<1x256xi32>
    %247 = arith.addi %2, %246 : vector<1x256xi32>
    %c16_i32_102 = arith.constant 16 : i32
    %248 = vector.broadcast %c16_i32_102 : i32 to vector<1x256xi32>
    %249 = arith.cmpi slt, %247, %248 : vector<1x256xi32>
    %250 = arith.andi %245, %249 : vector<1x256xi1>
    %c-1_i32_103 = arith.constant -1 : i32
    %251 = vector.broadcast %c-1_i32_103 : i32 to vector<1x256xi32>
    %252 = arith.addi %4, %251 : vector<1x256xi32>
    %c0_i32_104 = arith.constant 0 : i32
    %253 = vector.broadcast %c0_i32_104 : i32 to vector<1x256xi32>
    %254 = arith.cmpi sge, %252, %253 : vector<1x256xi32>
    %255 = arith.andi %250, %254 : vector<1x256xi1>
    %c-1_i32_105 = arith.constant -1 : i32
    %256 = vector.broadcast %c-1_i32_105 : i32 to vector<1x256xi32>
    %257 = arith.addi %4, %256 : vector<1x256xi32>
    %c16_i32_106 = arith.constant 16 : i32
    %258 = vector.broadcast %c16_i32_106 : i32 to vector<1x256xi32>
    %259 = arith.cmpi slt, %257, %258 : vector<1x256xi32>
    %260 = arith.andi %255, %259 : vector<1x256xi1>
    %cst_107 = arith.constant 0.000000e+00 : f32
    %261 = vector.shape_cast %260 : vector<1x256xi1> to vector<1x256xi1>
    %262 = vector.broadcast %261 : vector<1x256xi1> to vector<16x256xi1>
    %263 = vector.broadcast %cst_107 : f32 to vector<16x256xf32>
    %264 = arith.select %262, %241, %263 : vector<16x256xi1>, vector<16x256xf32>
    %265 = arith.truncf %264 : vector<16x256xf32> to vector<16x256xbf16>
    %c0_108 = arith.constant 0 : index
    %c256_109 = arith.constant 256 : index
    %266 = vector.load %arg7[%c0_108, %c256_109] : memref<144x512xbf16, #tpu.memory_space<vmem>>, vector<16x256xbf16>
    tpu.vector_store %arg7[%c0_108, %c256_109], %265 {strides = array<i32>} : memref<144x512xbf16, #tpu.memory_space<vmem>>, vector<16x256xbf16>,
    %c16_i32_110 = arith.constant 16 : i32
    %267 = tpu.dynamic_rotate %240 by %c16_i32_110 dim 1 : vector<16x256xf32>, i32 -> vector<16x256xf32>
    %c-1_i32_111 = arith.constant -1 : i32
    %268 = vector.broadcast %c-1_i32_111 : i32 to vector<1x256xi32>
    %269 = arith.addi %2, %268 : vector<1x256xi32>
    %c0_i32_112 = arith.constant 0 : i32
    %270 = vector.broadcast %c0_i32_112 : i32 to vector<1x256xi32>
    %271 = arith.cmpi sge, %269, %270 : vector<1x256xi32>
    %c-1_i32_113 = arith.constant -1 : i32
    %272 = vector.broadcast %c-1_i32_113 : i32 to vector<1x256xi32>
    %273 = arith.addi %2, %272 : vector<1x256xi32>
    %c16_i32_114 = arith.constant 16 : i32
    %274 = vector.broadcast %c16_i32_114 : i32 to vector<1x256xi32>
    %275 = arith.cmpi slt, %273, %274 : vector<1x256xi32>
    %276 = arith.andi %271, %275 : vector<1x256xi1>
    %c0_i32_115 = arith.constant 0 : i32
    %277 = vector.broadcast %c0_i32_115 : i32 to vector<1x256xi32>
    %278 = arith.addi %4, %277 : vector<1x256xi32>
    %c0_i32_116 = arith.constant 0 : i32
    %279 = vector.broadcast %c0_i32_116 : i32 to vector<1x256xi32>
    %280 = arith.cmpi sge, %278, %279 : vector<1x256xi32>
    %281 = arith.andi %276, %280 : vector<1x256xi1>
    %c0_i32_117 = arith.constant 0 : i32
    %282 = vector.broadcast %c0_i32_117 : i32 to vector<1x256xi32>
    %283 = arith.addi %4, %282 : vector<1x256xi32>
    %c16_i32_118 = arith.constant 16 : i32
    %284 = vector.broadcast %c16_i32_118 : i32 to vector<1x256xi32>
    %285 = arith.cmpi slt, %283, %284 : vector<1x256xi32>
    %286 = arith.andi %281, %285 : vector<1x256xi1>
    %cst_119 = arith.constant 0.000000e+00 : f32
    %287 = vector.shape_cast %286 : vector<1x256xi1> to vector<1x256xi1>
    %288 = vector.broadcast %287 : vector<1x256xi1> to vector<16x256xi1>
    %289 = vector.broadcast %cst_119 : f32 to vector<16x256xf32>
    %290 = arith.select %288, %267, %289 : vector<16x256xi1>, vector<16x256xf32>
    %291 = arith.truncf %290 : vector<16x256xf32> to vector<16x256xbf16>
    %c16_120 = arith.constant 16 : index
    %c256_121 = arith.constant 256 : index
    %292 = vector.load %arg7[%c16_120, %c256_121] : memref<144x512xbf16, #tpu.memory_space<vmem>>, vector<16x256xbf16>
    tpu.vector_store %arg7[%c16_120, %c256_121], %291 {strides = array<i32>} : memref<144x512xbf16, #tpu.memory_space<vmem>>, vector<16x256xbf16>,
    %c15_i32_122 = arith.constant 15 : i32
    %293 = tpu.dynamic_rotate %240 by %c15_i32_122 dim 1 : vector<16x256xf32>, i32 -> vector<16x256xf32>
    %c-1_i32_123 = arith.constant -1 : i32
    %294 = vector.broadcast %c-1_i32_123 : i32 to vector<1x256xi32>
    %295 = arith.addi %2, %294 : vector<1x256xi32>
    %c0_i32_124 = arith.constant 0 : i32
    %296 = vector.broadcast %c0_i32_124 : i32 to vector<1x256xi32>
    %297 = arith.cmpi sge, %295, %296 : vector<1x256xi32>
    %c-1_i32_125 = arith.constant -1 : i32
    %298 = vector.broadcast %c-1_i32_125 : i32 to vector<1x256xi32>
    %299 = arith.addi %2, %298 : vector<1x256xi32>
    %c16_i32_126 = arith.constant 16 : i32
    %300 = vector.broadcast %c16_i32_126 : i32 to vector<1x256xi32>
    %301 = arith.cmpi slt, %299, %300 : vector<1x256xi32>
    %302 = arith.andi %297, %301 : vector<1x256xi1>
    %c1_i32_127 = arith.constant 1 : i32
    %303 = vector.broadcast %c1_i32_127 : i32 to vector<1x256xi32>
    %304 = arith.addi %4, %303 : vector<1x256xi32>
    %c0_i32_128 = arith.constant 0 : i32
    %305 = vector.broadcast %c0_i32_128 : i32 to vector<1x256xi32>
    %306 = arith.cmpi sge, %304, %305 : vector<1x256xi32>
    %307 = arith.andi %302, %306 : vector<1x256xi1>
    %c1_i32_129 = arith.constant 1 : i32
    %308 = vector.broadcast %c1_i32_129 : i32 to vector<1x256xi32>
    %309 = arith.addi %4, %308 : vector<1x256xi32>
    %c16_i32_130 = arith.constant 16 : i32
    %310 = vector.broadcast %c16_i32_130 : i32 to vector<1x256xi32>
    %311 = arith.cmpi slt, %309, %310 : vector<1x256xi32>
    %312 = arith.andi %307, %311 : vector<1x256xi1>
    %cst_131 = arith.constant 0.000000e+00 : f32
    %313 = vector.shape_cast %312 : vector<1x256xi1> to vector<1x256xi1>
    %314 = vector.broadcast %313 : vector<1x256xi1> to vector<16x256xi1>
    %315 = vector.broadcast %cst_131 : f32 to vector<16x256xf32>
    %316 = arith.select %314, %293, %315 : vector<16x256xi1>, vector<16x256xf32>
    %317 = arith.truncf %316 : vector<16x256xf32> to vector<16x256xbf16>
    %c32_132 = arith.constant 32 : index
    %c256_133 = arith.constant 256 : index
    %318 = vector.load %arg7[%c32_132, %c256_133] : memref<144x512xbf16, #tpu.memory_space<vmem>>, vector<16x256xbf16>
    tpu.vector_store %arg7[%c32_132, %c256_133], %317 {strides = array<i32>} : memref<144x512xbf16, #tpu.memory_space<vmem>>, vector<16x256xbf16>,
    %c1_i32_134 = arith.constant 1 : i32
    %319 = tpu.dynamic_rotate %240 by %c1_i32_134 dim 1 : vector<16x256xf32>, i32 -> vector<16x256xf32>
    %c0_i32_135 = arith.constant 0 : i32
    %320 = vector.broadcast %c0_i32_135 : i32 to vector<1x256xi32>
    %321 = arith.addi %2, %320 : vector<1x256xi32>
    %c0_i32_136 = arith.constant 0 : i32
    %322 = vector.broadcast %c0_i32_136 : i32 to vector<1x256xi32>
    %323 = arith.cmpi sge, %321, %322 : vector<1x256xi32>
    %c0_i32_137 = arith.constant 0 : i32
    %324 = vector.broadcast %c0_i32_137 : i32 to vector<1x256xi32>
    %325 = arith.addi %2, %324 : vector<1x256xi32>
    %c16_i32_138 = arith.constant 16 : i32
    %326 = vector.broadcast %c16_i32_138 : i32 to vector<1x256xi32>
    %327 = arith.cmpi slt, %325, %326 : vector<1x256xi32>
    %328 = arith.andi %323, %327 : vector<1x256xi1>
    %c-1_i32_139 = arith.constant -1 : i32
    %329 = vector.broadcast %c-1_i32_139 : i32 to vector<1x256xi32>
    %330 = arith.addi %4, %329 : vector<1x256xi32>
    %c0_i32_140 = arith.constant 0 : i32
    %331 = vector.broadcast %c0_i32_140 : i32 to vector<1x256xi32>
    %332 = arith.cmpi sge, %330, %331 : vector<1x256xi32>
    %333 = arith.andi %328, %332 : vector<1x256xi1>
    %c-1_i32_141 = arith.constant -1 : i32
    %334 = vector.broadcast %c-1_i32_141 : i32 to vector<1x256xi32>
    %335 = arith.addi %4, %334 : vector<1x256xi32>
    %c16_i32_142 = arith.constant 16 : i32
    %336 = vector.broadcast %c16_i32_142 : i32 to vector<1x256xi32>
    %337 = arith.cmpi slt, %335, %336 : vector<1x256xi32>
    %338 = arith.andi %333, %337 : vector<1x256xi1>
    %cst_143 = arith.constant 0.000000e+00 : f32
    %339 = vector.shape_cast %338 : vector<1x256xi1> to vector<1x256xi1>
    %340 = vector.broadcast %339 : vector<1x256xi1> to vector<16x256xi1>
    %341 = vector.broadcast %cst_143 : f32 to vector<16x256xf32>
    %342 = arith.select %340, %319, %341 : vector<16x256xi1>, vector<16x256xf32>
    %343 = arith.truncf %342 : vector<16x256xf32> to vector<16x256xbf16>
    %c48_144 = arith.constant 48 : index
    %c256_145 = arith.constant 256 : index
    %344 = vector.load %arg7[%c48_144, %c256_145] : memref<144x512xbf16, #tpu.memory_space<vmem>>, vector<16x256xbf16>
    tpu.vector_store %arg7[%c48_144, %c256_145], %343 {strides = array<i32>} : memref<144x512xbf16, #tpu.memory_space<vmem>>, vector<16x256xbf16>,
    %345 = arith.truncf %240 : vector<16x256xf32> to vector<16x256xbf16>
    %c64_146 = arith.constant 64 : index
    %c256_147 = arith.constant 256 : index
    %346 = vector.load %arg7[%c64_146, %c256_147] : memref<144x512xbf16, #tpu.memory_space<vmem>>, vector<16x256xbf16>
    tpu.vector_store %arg7[%c64_146, %c256_147], %345 {strides = array<i32>} : memref<144x512xbf16, #tpu.memory_space<vmem>>, vector<16x256xbf16>,
    %c255_i32_148 = arith.constant 255 : i32
    %347 = tpu.dynamic_rotate %240 by %c255_i32_148 dim 1 : vector<16x256xf32>, i32 -> vector<16x256xf32>
    %c0_i32_149 = arith.constant 0 : i32
    %348 = vector.broadcast %c0_i32_149 : i32 to vector<1x256xi32>
    %349 = arith.addi %2, %348 : vector<1x256xi32>
    %c0_i32_150 = arith.constant 0 : i32
    %350 = vector.broadcast %c0_i32_150 : i32 to vector<1x256xi32>
    %351 = arith.cmpi sge, %349, %350 : vector<1x256xi32>
    %c0_i32_151 = arith.constant 0 : i32
    %352 = vector.broadcast %c0_i32_151 : i32 to vector<1x256xi32>
    %353 = arith.addi %2, %352 : vector<1x256xi32>
    %c16_i32_152 = arith.constant 16 : i32
    %354 = vector.broadcast %c16_i32_152 : i32 to vector<1x256xi32>
    %355 = arith.cmpi slt, %353, %354 : vector<1x256xi32>
    %356 = arith.andi %351, %355 : vector<1x256xi1>
    %c1_i32_153 = arith.constant 1 : i32
    %357 = vector.broadcast %c1_i32_153 : i32 to vector<1x256xi32>
    %358 = arith.addi %4, %357 : vector<1x256xi32>
    %c0_i32_154 = arith.constant 0 : i32
    %359 = vector.broadcast %c0_i32_154 : i32 to vector<1x256xi32>
    %360 = arith.cmpi sge, %358, %359 : vector<1x256xi32>
    %361 = arith.andi %356, %360 : vector<1x256xi1>
    %c1_i32_155 = arith.constant 1 : i32
    %362 = vector.broadcast %c1_i32_155 : i32 to vector<1x256xi32>
    %363 = arith.addi %4, %362 : vector<1x256xi32>
    %c16_i32_156 = arith.constant 16 : i32
    %364 = vector.broadcast %c16_i32_156 : i32 to vector<1x256xi32>
    %365 = arith.cmpi slt, %363, %364 : vector<1x256xi32>
    %366 = arith.andi %361, %365 : vector<1x256xi1>
    %cst_157 = arith.constant 0.000000e+00 : f32
    %367 = vector.shape_cast %366 : vector<1x256xi1> to vector<1x256xi1>
    %368 = vector.broadcast %367 : vector<1x256xi1> to vector<16x256xi1>
    %369 = vector.broadcast %cst_157 : f32 to vector<16x256xf32>
    %370 = arith.select %368, %347, %369 : vector<16x256xi1>, vector<16x256xf32>
    %371 = arith.truncf %370 : vector<16x256xf32> to vector<16x256xbf16>
    %c80_158 = arith.constant 80 : index
    %c256_159 = arith.constant 256 : index
    %372 = vector.load %arg7[%c80_158, %c256_159] : memref<144x512xbf16, #tpu.memory_space<vmem>>, vector<16x256xbf16>
    tpu.vector_store %arg7[%c80_158, %c256_159], %371 {strides = array<i32>} : memref<144x512xbf16, #tpu.memory_space<vmem>>, vector<16x256xbf16>,
    %c241_i32_160 = arith.constant 241 : i32
    %373 = tpu.dynamic_rotate %240 by %c241_i32_160 dim 1 : vector<16x256xf32>, i32 -> vector<16x256xf32>
    %c1_i32_161 = arith.constant 1 : i32
    %374 = vector.broadcast %c1_i32_161 : i32 to vector<1x256xi32>
    %375 = arith.addi %2, %374 : vector<1x256xi32>
    %c0_i32_162 = arith.constant 0 : i32
    %376 = vector.broadcast %c0_i32_162 : i32 to vector<1x256xi32>
    %377 = arith.cmpi sge, %375, %376 : vector<1x256xi32>
    %c1_i32_163 = arith.constant 1 : i32
    %378 = vector.broadcast %c1_i32_163 : i32 to vector<1x256xi32>
    %379 = arith.addi %2, %378 : vector<1x256xi32>
    %c16_i32_164 = arith.constant 16 : i32
    %380 = vector.broadcast %c16_i32_164 : i32 to vector<1x256xi32>
    %381 = arith.cmpi slt, %379, %380 : vector<1x256xi32>
    %382 = arith.andi %377, %381 : vector<1x256xi1>
    %c-1_i32_165 = arith.constant -1 : i32
    %383 = vector.broadcast %c-1_i32_165 : i32 to vector<1x256xi32>
    %384 = arith.addi %4, %383 : vector<1x256xi32>
    %c0_i32_166 = arith.constant 0 : i32
    %385 = vector.broadcast %c0_i32_166 : i32 to vector<1x256xi32>
    %386 = arith.cmpi sge, %384, %385 : vector<1x256xi32>
    %387 = arith.andi %382, %386 : vector<1x256xi1>
    %c-1_i32_167 = arith.constant -1 : i32
    %388 = vector.broadcast %c-1_i32_167 : i32 to vector<1x256xi32>
    %389 = arith.addi %4, %388 : vector<1x256xi32>
    %c16_i32_168 = arith.constant 16 : i32
    %390 = vector.broadcast %c16_i32_168 : i32 to vector<1x256xi32>
    %391 = arith.cmpi slt, %389, %390 : vector<1x256xi32>
    %392 = arith.andi %387, %391 : vector<1x256xi1>
    %cst_169 = arith.constant 0.000000e+00 : f32
    %393 = vector.shape_cast %392 : vector<1x256xi1> to vector<1x256xi1>
    %394 = vector.broadcast %393 : vector<1x256xi1> to vector<16x256xi1>
    %395 = vector.broadcast %cst_169 : f32 to vector<16x256xf32>
    %396 = arith.select %394, %373, %395 : vector<16x256xi1>, vector<16x256xf32>
    %397 = arith.truncf %396 : vector<16x256xf32> to vector<16x256xbf16>
    %c96_170 = arith.constant 96 : index
    %c256_171 = arith.constant 256 : index
    %398 = vector.load %arg7[%c96_170, %c256_171] : memref<144x512xbf16, #tpu.memory_space<vmem>>, vector<16x256xbf16>
    tpu.vector_store %arg7[%c96_170, %c256_171], %397 {strides = array<i32>} : memref<144x512xbf16, #tpu.memory_space<vmem>>, vector<16x256xbf16>,
    %c240_i32_172 = arith.constant 240 : i32
    %399 = tpu.dynamic_rotate %240 by %c240_i32_172 dim 1 : vector<16x256xf32>, i32 -> vector<16x256xf32>
    %c1_i32_173 = arith.constant 1 : i32
    %400 = vector.broadcast %c1_i32_173 : i32 to vector<1x256xi32>
    %401 = arith.addi %2, %400 : vector<1x256xi32>
    %c0_i32_174 = arith.constant 0 : i32
    %402 = vector.broadcast %c0_i32_174 : i32 to vector<1x256xi32>
    %403 = arith.cmpi sge, %401, %402 : vector<1x256xi32>
    %c1_i32_175 = arith.constant 1 : i32
    %404 = vector.broadcast %c1_i32_175 : i32 to vector<1x256xi32>
    %405 = arith.addi %2, %404 : vector<1x256xi32>
    %c16_i32_176 = arith.constant 16 : i32
    %406 = vector.broadcast %c16_i32_176 : i32 to vector<1x256xi32>
    %407 = arith.cmpi slt, %405, %406 : vector<1x256xi32>
    %408 = arith.andi %403, %407 : vector<1x256xi1>
    %c0_i32_177 = arith.constant 0 : i32
    %409 = vector.broadcast %c0_i32_177 : i32 to vector<1x256xi32>
    %410 = arith.addi %4, %409 : vector<1x256xi32>
    %c0_i32_178 = arith.constant 0 : i32
    %411 = vector.broadcast %c0_i32_178 : i32 to vector<1x256xi32>
    %412 = arith.cmpi sge, %410, %411 : vector<1x256xi32>
    %413 = arith.andi %408, %412 : vector<1x256xi1>
    %c0_i32_179 = arith.constant 0 : i32
    %414 = vector.broadcast %c0_i32_179 : i32 to vector<1x256xi32>
    %415 = arith.addi %4, %414 : vector<1x256xi32>
    %c16_i32_180 = arith.constant 16 : i32
    %416 = vector.broadcast %c16_i32_180 : i32 to vector<1x256xi32>
    %417 = arith.cmpi slt, %415, %416 : vector<1x256xi32>
    %418 = arith.andi %413, %417 : vector<1x256xi1>
    %cst_181 = arith.constant 0.000000e+00 : f32
    %419 = vector.shape_cast %418 : vector<1x256xi1> to vector<1x256xi1>
    %420 = vector.broadcast %419 : vector<1x256xi1> to vector<16x256xi1>
    %421 = vector.broadcast %cst_181 : f32 to vector<16x256xf32>
    %422 = arith.select %420, %399, %421 : vector<16x256xi1>, vector<16x256xf32>
    %423 = arith.truncf %422 : vector<16x256xf32> to vector<16x256xbf16>
    %c112_182 = arith.constant 112 : index
    %c256_183 = arith.constant 256 : index
    %424 = vector.load %arg7[%c112_182, %c256_183] : memref<144x512xbf16, #tpu.memory_space<vmem>>, vector<16x256xbf16>
    tpu.vector_store %arg7[%c112_182, %c256_183], %423 {strides = array<i32>} : memref<144x512xbf16, #tpu.memory_space<vmem>>, vector<16x256xbf16>,
    %c239_i32_184 = arith.constant 239 : i32
    %425 = tpu.dynamic_rotate %240 by %c239_i32_184 dim 1 : vector<16x256xf32>, i32 -> vector<16x256xf32>
    %c1_i32_185 = arith.constant 1 : i32
    %426 = vector.broadcast %c1_i32_185 : i32 to vector<1x256xi32>
    %427 = arith.addi %2, %426 : vector<1x256xi32>
    %c0_i32_186 = arith.constant 0 : i32
    %428 = vector.broadcast %c0_i32_186 : i32 to vector<1x256xi32>
    %429 = arith.cmpi sge, %427, %428 : vector<1x256xi32>
    %c1_i32_187 = arith.constant 1 : i32
    %430 = vector.broadcast %c1_i32_187 : i32 to vector<1x256xi32>
    %431 = arith.addi %2, %430 : vector<1x256xi32>
    %c16_i32_188 = arith.constant 16 : i32
    %432 = vector.broadcast %c16_i32_188 : i32 to vector<1x256xi32>
    %433 = arith.cmpi slt, %431, %432 : vector<1x256xi32>
    %434 = arith.andi %429, %433 : vector<1x256xi1>
    %c1_i32_189 = arith.constant 1 : i32
    %435 = vector.broadcast %c1_i32_189 : i32 to vector<1x256xi32>
    %436 = arith.addi %4, %435 : vector<1x256xi32>
    %c0_i32_190 = arith.constant 0 : i32
    %437 = vector.broadcast %c0_i32_190 : i32 to vector<1x256xi32>
    %438 = arith.cmpi sge, %436, %437 : vector<1x256xi32>
    %439 = arith.andi %434, %438 : vector<1x256xi1>
    %c1_i32_191 = arith.constant 1 : i32
    %440 = vector.broadcast %c1_i32_191 : i32 to vector<1x256xi32>
    %441 = arith.addi %4, %440 : vector<1x256xi32>
    %c16_i32_192 = arith.constant 16 : i32
    %442 = vector.broadcast %c16_i32_192 : i32 to vector<1x256xi32>
    %443 = arith.cmpi slt, %441, %442 : vector<1x256xi32>
    %444 = arith.andi %439, %443 : vector<1x256xi1>
    %cst_193 = arith.constant 0.000000e+00 : f32
    %445 = vector.shape_cast %444 : vector<1x256xi1> to vector<1x256xi1>
    %446 = vector.broadcast %445 : vector<1x256xi1> to vector<16x256xi1>
    %447 = vector.broadcast %cst_193 : f32 to vector<16x256xf32>
    %448 = arith.select %446, %425, %447 : vector<16x256xi1>, vector<16x256xf32>
    %449 = arith.truncf %448 : vector<16x256xf32> to vector<16x256xbf16>
    %c128_194 = arith.constant 128 : index
    %c256_195 = arith.constant 256 : index
    %450 = vector.load %arg7[%c128_194, %c256_195] : memref<144x512xbf16, #tpu.memory_space<vmem>>, vector<16x256xbf16>
    tpu.vector_store %arg7[%c128_194, %c256_195], %449 {strides = array<i32>} : memref<144x512xbf16, #tpu.memory_space<vmem>>, vector<16x256xbf16>,
    %c0_196 = arith.constant 0 : index
    %c0_197 = arith.constant 0 : index
    %451 = vector.load %arg4[%c0_196, %c0_197] : memref<16x144xbf16, #tpu.memory_space<vmem>>, vector<16x144xbf16>
    %c0_198 = arith.constant 0 : index
    %c0_199 = arith.constant 0 : index
    %452 = vector.load %arg7[%c0_198, %c0_199] : memref<144x512xbf16, #tpu.memory_space<vmem>>, vector<144x512xbf16>
    %cst_200 = arith.constant dense<0.000000e+00> : vector<16x512xf32>
    %453 = tpu.matmul %451, %452, %cst_200 {dimension_numbers = #tpu.dot_dimension_numbers<[1], [0], [0], [1], [0, 0, 1, 1], [], []>} : vector<16x144xbf16>, vector<144x512xbf16>, vector<16x512xf32> -> vector<16x512xf32>
    %c0_201 = arith.constant 0 : index
    %c0_202 = arith.constant 0 : index
    %454 = vector.load %arg5[%c0_201, %c0_202] : memref<16x1xf32, #tpu.memory_space<vmem>>, vector<16x1xf32>
    %455 = vector.broadcast %454 : vector<16x1xf32> to vector<16x512xf32>
    %456 = arith.addf %453, %455 : vector<16x512xf32>
    %cst_203 = arith.constant 0.000000e+00 : f32
    %457 = vector.broadcast %cst_203 : f32 to vector<16x512xf32>
    %458 = arith.maximumf %456, %457 : vector<16x512xf32>
    %c0_204 = arith.constant 0 : index
    %c0_205 = arith.constant 0 : index
    %459 = vector.load %arg6[%c0_204, %c0_205] : memref<16x512xf32, #tpu.memory_space<vmem>>, vector<16x512xf32>
    tpu.vector_store %arg6[%c0_204, %c0_205], %458 {strides = array<i32>} : memref<16x512xf32, #tpu.memory_space<vmem>>, vector<16x512xf32>,
    return
  }
  func.func @transform_0(%arg0: i32) -> (i32, i32) {
    %c0_i32 = arith.constant 0 : i32
    %c0_i32_0 = arith.constant 0 : i32
    return %c0_i32, %arg0 : i32, i32
  }
  func.func @transform_1(%arg0: i32) -> (i32, i32) {
    %c0_i32 = arith.constant 0 : i32
    %c0_i32_0 = arith.constant 0 : i32
    %c0_i32_1 = arith.constant 0 : i32
    return %c0_i32, %c0_i32_0 : i32, i32
  }
  func.func @transform_2(%arg0: i32) -> (i32, i32) {
    %c0_i32 = arith.constant 0 : i32
    %c0_i32_0 = arith.constant 0 : i32
    %c0_i32_1 = arith.constant 0 : i32
    return %c0_i32, %c0_i32_0 : i32, i32
  }
  func.func @transform_3(%arg0: i32) -> (i32, i32) {
    %c0_i32 = arith.constant 0 : i32
    %c0_i32_0 = arith.constant 0 : i32
    %c0_i32_1 = arith.constant 0 : i32
    return %c0_i32, %c0_i32_0 : i32, i32
  }
  func.func @transform_4(%arg0: i32) -> (i32, i32) {
    %c0_i32 = arith.constant 0 : i32
    %c0_i32_0 = arith.constant 0 : i32
    %c0_i32_1 = arith.constant 0 : i32
    return %c0_i32, %c0_i32_0 : i32, i32
  }
  func.func @transform_5(%arg0: i32) -> (i32, i32) {
    %c0_i32 = arith.constant 0 : i32
    %c0_i32_0 = arith.constant 0 : i32
    return %c0_i32, %arg0 : i32, i32
  }
}

</mosaic_0001>

<bundles_post_ra>
// kernel: tpu_custom_call.1
= control target key start
LH: loop header
LB: loop body
LE: loop exit
PB: predicated region body
PF: predicated region fallthrough
CT: control target
= control target key end

     0   :  { %10 = vsyncpa [#allocation4], 0  ;;  %s1949_s0 = inlined_call_operand.hbm [shape: f32[16,512], index: 0, kind: input, shape index: {}]   ;;  %s1950_s1 = inlined_call_operand.vmem [shape: f32[16,16], index: 1, kind: input, shape index: {}]   ;;  %s1951_s2 = inlined_call_operand.vmem [shape: f32[16,1], index: 2, kind: input, shape index: {}]   ;;  %s1952_s3 = inlined_call_operand.vmem [shape: bf16[16,144], index: 3, kind: input, shape index: {}]   ;;  %s1953_s4 = inlined_call_operand.vmem [shape: f32[16,1], index: 4, kind: input, shape index: {}]   ;;  %s1954_s5 = inlined_call_operand.hbm [shape: f32[16,512], index: 5, kind: output, shape index: {}]  }
   0x1   :  { %11 = vsyncpa [#allocation5], 0  ;;  %s1249_s18 = smov [#allocation3]   ;;  %s1201_s22 = scalar_lea.hbm %s1949_s0, 1024 }
   0x2   :  { %s17_s19 = sshll.u32 %s1249_s18, 4  ;;  %p1202_p0 = scmp.ne.s32.totalorder %s1949_s0, %s1201_s22  ;;  %s18_s19 = int_to_ptr.vmem [resolvable:$true] %s17_s19 }
   0x3   :  { %p1205_p1 = scmp.lt.u32.totalorder %s1201_s22, %s1949_s0 }
   0x5   :  { %p1207_p2 = pnand %p1205_p1, %p1202_p0 }
   0x7   :  { %1210 = shalt.err (!%p1207_p2)
}
   0x8   :  { %s1211_s27 = scalar_lea.vmem %s18_s19, 1024  ;;  %p1216_p4 = scmp.lt.s32.totalorder %s18_s19, %s18_s19 }
   0x9   :  { %p1212_p3 = scmp.ne.s32.totalorder %s18_s19, %s1211_s27  ;;  %p1217_p5 = scmp.lt.s32.totalorder %s1211_s27, %s1211_s27 }
   0xb   :  { %p1218_p6 = por %p1217_p5, %p1216_p4 }
   0xd   :  { %p1219_p7 = pnand %p1218_p6, %p1212_p3 }
   0xf   :  { %1222 = shalt.err (!%p1219_p7)
}
  0x10   :  { %s1250_s28 = smov 512   ;;  %s1251_s29 = smov 32  }
  0x11   :  { %23 = dma.hbm_to_vmem [thread:$0]  %s1949_s0, 1024, %s18_s19, [#allocation4], %s1250_s28, %s1250_s28, %s1251_s29  }
  0x12   :  { %1245 = dma.done.wait [#allocation4], 1024  }
  0x13   :  { %1246 = vsyncadd [#allocation4], 4294966272  ;;  %v1307_v0 = vld [vmem:[#allocation3 + $0x10] sm:$0xff]  ;;  %v1309_v1 = vld [vmem:[#allocation3 + $0x18] sm:$0xff]  ;;  %vm59_vm0 = vcmask 130048   ;;  %v1252_v24 = vmov 0   ;;  %v36_v62 = vlaneseq }
  0x14   :  { %v43_v2 = vld [vmem:[#allocation3] sm:$0xff]  ;;  %v435_v3 = vadd.f32 %v1309_v1, %v1307_v0  ;;  %v44_v4 = vld [vmem:[#allocation3 + $0x8] sm:$0xff]  ;;  %v1313_v5 = vld [vmem:[#allocation3 + $0x30] sm:$0xff]  ;;  %1037 = vset.pattern.permute.xlu1 %v1252_v24  ;;  %1036 = vset.pattern.permute.xlu0 %v1252_v24  ;;  %s1255_s14 = smov 15   ;;  %s1256_s15 = smov 1  }
  0x15   :  { %v1315_v6 = vld [vmem:[#allocation3 + $0x38] sm:$0xff]  ;;  %v47_v7 = vadd.f32 %v44_v4, %v43_v2  ;;  %v45_v8 = vld [vmem:[#allocation3 + $0x20] sm:$0xff]  ;;  %v46_v9 = vld [vmem:[#allocation3 + $0x28] sm:$0xff]  ;;  %s1257_s16 = smov 127   ;;  %s1258_s17 = smov 113   ;;  %v1382_v63 = vand.u32 127, %v36_v62 }
  0x16   :  { %436 = vadd.xlane.f32.xlu1 %v435_v3  ;;  %v438_v10 = vadd.f32 %v1315_v6, %v1313_v5  ;;  %v50_v11 = vadd.f32 %v46_v9, %v45_v8  ;;  %v55_v12 = vld [vmem:[%s1950_s1] sm:$0xff]  ;;  %v56_v23 = vld [vmem:[%s1950_s1 + $0x8] sm:$0xff]  ;;  %s1253_s1 = smov 16   ;;  %s1259_s18 = smov 112  }
  0x17   :  { %48 = vadd.xlane.f32.xlu0 %v47_v7  ;;  %1005 = vmatprep.mubr.msk.f32.mxu0 %vm59_vm0, %v55_v12  ;;  %v58_v25 = vld [vmem:[%s1951_s2 + $0x8] sm:$0xff]  ;;  %v57_v26 = vld [vmem:[%s1951_s2] sm:$0xff]  ;;  %s1254_s2 = smov 17   ;;  %s1260_s19 = smov 111   ;;  %vm165_vm9 = vcmp.lt.s32.totalorder %v1382_v63, 17  ;;  %vm208_vm14 = vcmp.lt.s32.totalorder %v1382_v63, 16 }
  0x18   :  { %1012 = vmatprep.mubr.msk.f32.mxu1 %vm59_vm0, %v55_v12  ;;  %v747_v59 = vld [vmem:[%s1953_s4 + $0x8] sm:$0xff]  ;;  %v746_v61 = vld [vmem:[%s1953_s4] sm:$0xff] }
  0x19   :  { %v1198_v60 = vld [vmem:[%s1952_s3 + $0x4] ss:$8 sps:$4 sm:$0xff]  }
  0x1a   :  { %439 = vadd.xlane.f32.xlu1 %v438_v10 }
  0x1b   :  { %51 = vadd.xlane.f32.xlu0 %v50_v11 }
  0xa3   :  { %v437_v13 = vpop.xlane.xlu1 %436 }
  0xa4   :  { %v49_v14 = vpop.xlane.xlu0 %48  ;;  %v441_v15 = vmul.f32 0.00390625, %v437_v13 }
  0xa5   :  { %v53_v19 = vmul.f32 0.00390625, %v49_v14 }
  0xa7   :  { %v440_v16 = vpop.xlane.xlu1 %439 }
  0xa8   :  { %v442_v17 = vmul.f32 0.00390625, %v440_v16  ;;  %v52_v18 = vpop.xlane.xlu0 %51 }
  0xa9   :  { %v54_v20 = vmul.f32 0.00390625, %v52_v18 }
  0xaa   :  { %v1019_v21 = vpack.c.bf16 %v442_v17, %v441_v15 }
  0xab   :  { %v1015_v22 = vpack.c.bf16 %v54_v20, %v53_v19 }
  0xac   :  { %1020 = vmatprep.subr.bf16.mxu1 %v1019_v21 }
  0xad   :  { %1016 = vmatprep.subr.bf16.mxu0 %v1015_v22  ;;  %1022 = vmatpush3.bf16.msra.mxu1 %v1019_v21 }
  0xae   :  { %1018 = vmatpush3.bf16.msra.mxu0 %v1015_v22 }
  0xb0   :  { %1013 = vmatmul.mubr.msk.f32.vlgmr.msra.gmra.mrb[0].mxu1 %vm59_vm0, %v56_v23 }
  0xb1   :  { %1006 = vmatmul.mubr.msk.f32.vlgmr.msra.gmra.mrb[0].mxu0 %vm59_vm0, %v56_v23  ;;  %896 = vmatprep.mubr.msk.bf16.mxu1 %vm59_vm0, %v1198_v60 }
  0xb2   :  { %895 = vmatprep.mubr.msk.bf16.mxu0 %vm59_vm0, %v1198_v60 }
 0x183   :  { %v1014_v27 = vpop.f32.mrb[0].mxu1 }
 0x184   :  { %v1007_v28 = vpop.f32.mrb[0].mxu0  ;;  %v519_v29 = vpop.f32.mrb[1].mxu1  ;;  %v525_v37 = vadd.f32 %v1014_v27, %v58_v25 }
 0x185   :  { %v138_v30 = vadd.f32 %v1007_v28, %v58_v25  ;;  %v132_v31 = vpop.f32.mrb[1].mxu0  ;;  %v520_v32 = vadd.f32 %v519_v29, %v57_v26 }
 0x186   :  { %v133_v33 = vadd.f32 %v132_v31, %v57_v26  ;;  %v529_v38 = vmax.f32 %v525_v37, 0.0 }
 0x187   :  { %v142_v34 = vmax.f32 %v138_v30, 0.0  ;;  %v528_v36 = vmax.f32 %v520_v32, 0.0 }
 0x188   :  { %v141_v35 = vmax.f32 %v133_v33, 0.0 }
 0x189   :  { %150 = vperm.xlu1 %1037, %v142_v34  }
 0x18a   :  { %145 = vperm.xlu0 %1036, %v141_v35  }
 0x18d   :  { %532 = vperm.xlu1 %1037, %v528_v36  }
 0x191   :  { %537 = vperm.xlu1 %1037, %v529_v38  }
 0x208   :  { %v151_v39 = vpop.permute.xlu1 %150 }
 0x209   :  { %v1335_v40 = vadd.f32 %v151_v39, %v45_v8  ;;  %v1337_v41 = vadd.f32 %v151_v39, %v46_v9  ;;  %v146_v42 = vpop.permute.xlu0 %145 }
 0x20a   :  { %v1339_v43 = vadd.f32 %v146_v42, %v43_v2  ;;  %v1341_v44 = vadd.f32 %v146_v42, %v44_v4  ;;  %v1388_v2 = vshra.s32 %v1382_v63, 4 }
 0x20c   :  { %v533_v45 = vpop.permute.xlu1 %532  ;;  %v1063_v46 = vpack.i.bf16 %v1337_v41, %v1341_v44  ;;  %v1038_v47 = vpack.i.bf16 %v1335_v40, %v1339_v43  ;;  %v304_v48 = vpack.c.bf16 %v1337_v41, %v1341_v44  ;;  %v303_v49 = vpack.c.bf16 %v1335_v40, %v1339_v43 }
 0x20d   :  { %v1352_v51 = vadd.f32 %v533_v45, %v1307_v0  ;;  %v1355_v52 = vadd.f32 %v533_v45, %v1309_v1  ;;  %v38_v0 = vadd.s32 128, %v1382_v63 }
 0x20e   :  { %1064 = vrot.lane.b32.xlu0 %v1063_v46, %s1253_s1  ;;  %1039 = vrot.lane.b32.xlu1 %v1038_v47, %s1254_s2 }
 0x20f   :  { %v1385_v1 = vshra.s32 %v38_v0, 4  ;;  %v42_v3 = vand.u32 15, %v38_v0 }
 0x210   :  { %v538_v50 = vpop.permute.xlu1 %537 }
 0x211   :  { %v1358_v53 = vadd.f32 %v538_v50, %v1313_v5  ;;  %v1361_v54 = vadd.f32 %v538_v50, %v1315_v6  ;;  %v171_v4 = vadd.s32 4294967295, %v1385_v1  ;;  %v41_v5 = vand.u32 15, %v1382_v63 }
 0x212   :  { %1044 = vrot.lane.b32.xlu1 %v1063_v46, %s1254_s2  ;;  %v170_v6 = vadd.s32 4294967295, %v1388_v2  ;;  %v1393_v7 = vadd.s32 4294967295, %v42_v3 }
 0x213   :  { %v1073_v55 = vpack.i.bf16 %v1361_v54, %v1355_v52  ;;  %v1048_v56 = vpack.i.bf16 %v1358_v53, %v1352_v51  ;;  %v625_v57 = vpack.c.bf16 %v1361_v54, %v1355_v52  ;;  %v624_v58 = vpack.c.bf16 %v1358_v53, %v1352_v51 }
 0x214   :  { %vm173_vm1 = vcmp.ge.s32.totalorder %v171_v4, 0  ;;  %vm175_vm2 = vcmp.lt.s32.totalorder %v171_v4, 16  ;;  %v1395_v8 = vadd.s32 4294967295, %v41_v5  ;;  %vm172_vm3 = vcmp.ge.s32.totalorder %v170_v6, 0 }
 0x215   :  { %1074 = vrot.lane.b32.xlu0 %v1073_v55, %s1253_s1  ;;  %vm174_vm4 = vcmp.lt.s32.totalorder %v170_v6, 16  ;;  %vm1397_vm5 = vmand %vm173_vm1, %vm175_vm2  ;;  %vm181_vm6 = vcmp.ge.s32.totalorder %v1393_v7, 0 }
 0x216   :  { %1049 = vrot.lane.b32.xlu1 %v1048_v56, %s1254_s2  ;;  %vm1402_vm7 = vmand %vm172_vm3, %vm174_vm4  ;;  %vm180_vm8 = vcmp.ge.s32.totalorder %v1395_v8, 0  ;;  %vm241_vm3 = vcmp.lt.s32.totalorder %v1382_v63, 15 }
 0x217   :  { %vm1412_vm10 = vmand %vm1397_vm5, %vm181_vm6 }
 0x218   :  { %vm1420_vm11 = vmand %vm1402_vm7, %vm180_vm8 }
 0x219   :  { %1084 = vrot.lane.b32.xlu0 %v1063_v46, %s1255_s14  ;;  %vm897_vm12 = vmpackc.low %vm1412_vm10, %vm1412_vm10  ;;  %vm282_vm10 = vcmp.ge.s32.totalorder %v1385_v1, 0 }
 0x21a   :  { %1054 = vrot.lane.b32.xlu1 %v1073_v55, %s1254_s2  ;;  %vm900_vm13 = vmpackc.low %vm1420_vm11, %vm1420_vm11  ;;  %vm284_vm11 = vcmp.lt.s32.totalorder %v1385_v1, 16 }
 0x21b   :  { %vm903_vm15 = vmpackc.low %vm1397_vm5, %vm1397_vm5 }
 0x21c   :  { %vm906_vm0 = vmpackc.low %vm1402_vm7, %vm1402_vm7 }
 0x21d   :  { %1094 = vrot.lane.b32.xlu0 %v1073_v55, %s1255_s14 }
 0x21e   :  { %1059 = vrot.lane.b32.xlu1 %v1038_v47, %s1253_s1 }
 0x221   :  { %1104 = vrot.lane.b32.xlu0 %v1063_v46, %s1256_s15 }
 0x222   :  { %1069 = vrot.lane.b32.xlu1 %v1048_v56, %s1253_s1 }
 0x225   :  { %1114 = vrot.lane.b32.xlu0 %v1073_v55, %s1256_s15 }
 0x226   :  { %1079 = vrot.lane.b32.xlu1 %v1038_v47, %s1255_s14 }
 0x229   :  { %1124 = vrot.lane.b32.xlu0 %v1063_v46, %s1257_s16 }
 0x22a   :  { %1089 = vrot.lane.b32.xlu1 %v1048_v56, %s1255_s14 }
 0x22d   :  { %1134 = vrot.lane.b32.xlu0 %v1073_v55, %s1257_s16 }
 0x22e   :  { %1099 = vrot.lane.b32.xlu1 %v1038_v47, %s1256_s15 }
 0x231   :  { %1144 = vrot.lane.b32.xlu0 %v1063_v46, %s1258_s17 }
 0x232   :  { %1109 = vrot.lane.b32.xlu1 %v1048_v56, %s1256_s15 }
 0x235   :  { %1154 = vrot.lane.b32.xlu0 %v1073_v55, %s1258_s17 }
 0x236   :  { %1119 = vrot.lane.b32.xlu1 %v1038_v47, %s1257_s16 }
 0x239   :  { %1164 = vrot.lane.b32.xlu0 %v1063_v46, %s1259_s18 }
 0x23a   :  { %1129 = vrot.lane.b32.xlu1 %v1048_v56, %s1257_s16 }
 0x23d   :  { %1174 = vrot.lane.b32.xlu0 %v1073_v55, %s1259_s18 }
 0x23e   :  { %1139 = vrot.lane.b32.xlu1 %v1038_v47, %s1258_s17 }
 0x241   :  { %1184 = vrot.lane.b32.xlu0 %v1063_v46, %s1260_s19  ;;  %v1461_v46 = vadd.s32 1, %v42_v3 }
 0x242   :  { %1149 = vrot.lane.b32.xlu1 %v1048_v56, %s1258_s17 }
 0x243   :  { %vm253_vm1 = vcmp.lt.s32.totalorder %v1461_v46, 16 }
 0x244   :  { %vm1518_vm4 = vmand %vm1397_vm5, %vm253_vm1 }
 0x245   :  { %1194 = vrot.lane.b32.xlu0 %v1073_v55, %s1260_s19  ;;  %vm909_vm5 = vmpackc.low %vm1518_vm4, %vm1518_vm4 }
 0x246   :  { %1159 = vrot.lane.b32.xlu1 %v1038_v47, %s1259_s18 }
 0x249   :  { %755 = vperm.xlu0 %1036, %v747_v59   ;;  %v1468_v59 = vadd.s32 1, %v41_v5 }
 0x24a   :  { %1169 = vrot.lane.b32.xlu1 %v1048_v56, %s1259_s18 }
 0x24b   :  { %vm252_vm2 = vcmp.lt.s32.totalorder %v1468_v59, 16 }
 0x24e   :  { %1179 = vrot.lane.b32.xlu1 %v1038_v47, %s1260_s19 }
 0x252   :  { %1189 = vrot.lane.b32.xlu1 %v1048_v56, %s1260_s19 }
 0x256   :  { %750 = vperm.xlu1 %1037, %v746_v61  }
 0x280   :  { %v1040_v9 = vpop.permute.xlu1 %1039  ;;  %v1065_v12 = vpop.permute.xlu0 %1064 }
 0x281   :  { %v1042_v15 = vunpack.i.h.bf16 %v1040_v9  ;;  %v1041_v16 = vunpack.i.l.bf16 %v1040_v9  ;;  %v1067_v47 = vunpack.i.h.bf16 %v1065_v12  ;;  %v1066_v50 = vunpack.i.l.bf16 %v1065_v12 }
 0x284   :  { %v1045_v13 = vpop.permute.xlu1 %1044 }
 0x285   :  { %v1047_v17 = vunpack.i.h.bf16 %v1045_v13  ;;  %v1046_v18 = vunpack.i.l.bf16 %v1045_v13 }
 0x287   :  { %v166_v20 = vsel %vm165_vm9, %v1041_v16, %v1046_v18  ;;  %v167_v21 = vsel %vm165_vm9, %v1042_v15, %v1047_v17  ;;  %v168_v22 = vsel %vm165_vm9, %v1046_v18, %v1041_v16  ;;  %v169_v23 = vsel %vm165_vm9, %v1047_v17, %v1042_v15  ;;  %v1075_v24 = vpop.permute.xlu0 %1074 }
 0x288   :  { %v898_v25 = vpack.c.bf16 %v167_v21, %v166_v20  ;;  %v901_v26 = vpack.c.bf16 %v169_v23, %v168_v22  ;;  %v1050_v27 = vpop.permute.xlu1 %1049  ;;  %v1077_v9 = vunpack.i.h.bf16 %v1075_v24  ;;  %v1076_v12 = vunpack.i.l.bf16 %v1075_v24 }
 0x289   :  { %v1052_v30 = vunpack.i.h.bf16 %v1050_v27  ;;  %v1051_v31 = vunpack.i.l.bf16 %v1050_v27 }
 0x28a   :  { %899 = vmatprep.subr.msk.bf16.mxu0 %vm897_vm12, %v898_v25 }
 0x28b   :  { %v1443_v28 = vpop.permute.xlu0 %1084  ;;  %902 = vmatpush1.bf16.msk.msra.mxu0 %vm900_vm13, %v901_v26 }
 0x28c   :  { %v1055_v29 = vpop.permute.xlu1 %1054  ;;  %v1087_v24 = vunpack.i.h.bf16 %v1443_v28  ;;  %v1086_v25 = vunpack.i.l.bf16 %v1443_v28 }
 0x28d   :  { %v1057_v32 = vunpack.i.h.bf16 %v1055_v29  ;;  %v1056_v33 = vunpack.i.l.bf16 %v1055_v29 }
 0x28f   :  { %v552_v34 = vsel %vm165_vm9, %v1051_v31, %v1056_v33  ;;  %v553_v35 = vsel %vm165_vm9, %v1052_v30, %v1057_v32  ;;  %v554_v36 = vsel %vm165_vm9, %v1056_v33, %v1051_v31  ;;  %v555_v37 = vsel %vm165_vm9, %v1057_v32, %v1052_v30  ;;  %v1458_v38 = vpop.permute.xlu0 %1094  ;;  %vm1528_vm9 = vmand %vm1402_vm7, %vm252_vm2 }
 0x290   :  { %v946_v39 = vpack.c.bf16 %v553_v35, %v552_v34  ;;  %v949_v42 = vpack.c.bf16 %v555_v37, %v554_v36  ;;  %v1060_v45 = vpop.permute.xlu1 %1059  ;;  %v1097_v36 = vunpack.i.h.bf16 %v1458_v38  ;;  %v1096_v37 = vunpack.i.l.bf16 %v1458_v38  ;;  %vm1568_vm7 = vmand %vm282_vm10, %vm284_vm11 }
 0x291   :  { %v1062_v55 = vunpack.i.h.bf16 %v1060_v45  ;;  %v1061_v56 = vunpack.i.l.bf16 %v1060_v45  ;;  %vm1605_vm10 = vmand %vm1568_vm7, %vm181_vm6 }
 0x292   :  { %947 = vmatprep.subr.msk.bf16.mxu1 %vm897_vm12, %v946_v39  ;;  %vm281_vm12 = vcmp.ge.s32.totalorder %v1388_v2, 0  ;;  %vm915_vm4 = vmpackc.low %vm1605_vm10, %vm1605_vm10 }
 0x293   :  { %v210_v60 = vsel %vm208_vm14, %v1062_v55, %v1067_v47  ;;  %v212_v61 = vsel %vm208_vm14, %v1067_v47, %v1062_v55  ;;  %v209_v62 = vsel %vm208_vm14, %v1061_v56, %v1066_v50  ;;  %v211_v0 = vsel %vm208_vm14, %v1066_v50, %v1061_v56  ;;  %v1478_v3 = vpop.permute.xlu0 %1104  ;;  %950 = vmatpush1.bf16.msk.msra.mxu1 %vm900_vm13, %v949_v42 }
 0x294   :  { %v904_v4 = vpack.c.bf16 %v210_v60, %v209_v62  ;;  %v907_v5 = vpack.c.bf16 %v212_v61, %v211_v0  ;;  %v1070_v6 = vpop.permute.xlu1 %1069  ;;  %vm283_vm13 = vcmp.lt.s32.totalorder %v1388_v2, 16 }
 0x295   :  { %v1072_v13 = vunpack.i.h.bf16 %v1070_v6  ;;  %v1071_v14 = vunpack.i.l.bf16 %v1070_v6 }
 0x296   :  { %905 = vmatprep.subr.msk.bf16.mxu0 %vm903_vm15, %v904_v4  ;;  %v1107_v4 = vunpack.i.h.bf16 %v1478_v3 }
 0x297   :  { %v573_v15 = vsel %vm208_vm14, %v1072_v13, %v1077_v9  ;;  %v575_v16 = vsel %vm208_vm14, %v1077_v9, %v1072_v13  ;;  %v572_v17 = vsel %vm208_vm14, %v1071_v14, %v1076_v12  ;;  %v574_v18 = vsel %vm208_vm14, %v1076_v12, %v1071_v14  ;;  %v1506_v19 = vpop.permute.xlu0 %1114  ;;  %908 = vmatpush1.bf16.msk.msra.mxu0 %vm906_vm0, %v907_v5  ;;  %vm912_vm14 = vmpackc.low %vm1528_vm9, %vm1528_vm9 }
 0x298   :  { %v952_v20 = vpack.c.bf16 %v573_v15, %v572_v17  ;;  %v955_v21 = vpack.c.bf16 %v575_v16, %v574_v18  ;;  %v1080_v22 = vpop.permute.xlu1 %1079  ;;  %v1106_v5 = vunpack.i.l.bf16 %v1478_v3  ;;  %vm315_vm9 = vcmp.lt.s32.totalorder %v1382_v63, 127 }
 0x299   :  { %v1082_v26 = vunpack.i.h.bf16 %v1080_v22  ;;  %v1081_v27 = vunpack.i.l.bf16 %v1080_v22  ;;  %v1116_v22 = vunpack.i.l.bf16 %v1506_v19 }
 0x29a   :  { %953 = vmatprep.subr.msk.bf16.mxu1 %vm903_vm15, %v952_v20  ;;  %vm1581_vm15 = vmand %vm281_vm12, %vm283_vm13 }
 0x29b   :  { %v243_v28 = vsel %vm241_vm3, %v1082_v26, %v1087_v24  ;;  %v245_v30 = vsel %vm241_vm3, %v1087_v24, %v1082_v26  ;;  %v242_v31 = vsel %vm241_vm3, %v1081_v27, %v1086_v25  ;;  %v244_v10 = vsel %vm241_vm3, %v1086_v25, %v1081_v27  ;;  %v1549_v32 = vpop.permute.xlu0 %1124  ;;  %956 = vmatpush1.bf16.msk.msra.mxu1 %vm906_vm0, %v955_v21  ;;  %vm1675_vm12 = vmand %vm1568_vm7, %vm253_vm1 }
 0x29c   :  { %v910_v33 = vpack.c.bf16 %v243_v28, %v242_v31  ;;  %v913_v34 = vpack.c.bf16 %v245_v30, %v244_v10  ;;  %v1090_v35 = vpop.permute.xlu1 %1089  ;;  %vm276_vm0 = vcmp.lt.s32.totalorder %v1382_v63, 1  ;;  %v1117_v21 = vunpack.i.h.bf16 %v1506_v19  ;;  %vm1685_vm13 = vmand %vm1581_vm15, %vm252_vm2 }
 0x29d   :  { %v1092_v39 = vunpack.i.h.bf16 %v1090_v35  ;;  %v1091_v42 = vunpack.i.l.bf16 %v1090_v35  ;;  %v350_v25 = vadd.s32 1, %v1385_v1  ;;  %v349_v26 = vadd.s32 1, %v1388_v2  ;;  %vm924_vm10 = vmpackc.low %vm1685_vm13, %vm1685_vm13 }
 0x29e   :  { %911 = vmatprep.subr.msk.bf16.mxu0 %vm909_vm5, %v910_v33  ;;  %v1127_v10 = vunpack.i.h.bf16 %v1549_v32  ;;  %v1126_v33 = vunpack.i.l.bf16 %v1549_v32 }
 0x29f   :  { %v593_v45 = vsel %vm241_vm3, %v1092_v39, %v1097_v36  ;;  %v595_v47 = vsel %vm241_vm3, %v1097_v36, %v1092_v39  ;;  %v592_v50 = vsel %vm241_vm3, %v1091_v42, %v1096_v37  ;;  %v594_v55 = vsel %vm241_vm3, %v1096_v37, %v1091_v42  ;;  %v1593_v56 = vpop.permute.xlu0 %1134  ;;  %914 = vmatpush1.bf16.msk.msra.mxu0 %vm912_vm14, %v913_v34  ;;  %vm1615_vm3 = vmand %vm1581_vm15, %vm180_vm8 }
 0x2a0   :  { %v958_v60 = vpack.c.bf16 %v593_v45, %v592_v50  ;;  %v961_v61 = vpack.c.bf16 %v595_v47, %v594_v55  ;;  %v1100_v62 = vpop.permute.xlu1 %1099  ;;  %vm918_vm11 = vmpackc.low %vm1615_vm3, %vm1615_vm3  ;;  %vm351_vm7 = vcmp.ge.s32.totalorder %v349_v26, 0  ;;  %v1137_v40 = vunpack.i.h.bf16 %v1593_v56  ;;  %v1200_v47 = vld [vmem:[%s1952_s3] ss:$8 sps:$4 sm:$0xff]   ;;  %s1261_s3 = smov [#allocation6]  }
 0x2a1   :  { %v1102_v6 = vunpack.i.h.bf16 %v1100_v62  ;;  %v1101_v9 = vunpack.i.l.bf16 %v1100_v62  ;;  %vm921_vm15 = vmpackc.low %vm1675_vm12, %vm1675_vm12  ;;  %v1136_v43 = vunpack.i.l.bf16 %v1593_v56  ;;  %vm381_vm12 = vcmp.lt.s32.totalorder %v1382_v63, 112  ;;  %s877_s27 = sshll.u32 %s1261_s3, 4  ;;  %s878_s27 = int_to_ptr.vmem [resolvable:$true] %s877_s27 }
 0x2a2   :  { %959 = vmatprep.subr.msk.bf16.mxu1 %vm909_vm5, %v958_v60  ;;  %vm352_vm5 = vcmp.ge.s32.totalorder %v350_v25, 0  ;;  %s1223_s30 = scalar_lea.vmem %s878_s27, 1024  ;;  %p1228_p9 = scmp.lt.s32.totalorder %s878_s27, %s878_s27 }
 0x2a3   :  { %v278_v13 = vsel %vm276_vm0, %v1102_v6, %v1107_v4  ;;  %v280_v3 = vsel %vm276_vm0, %v1107_v4, %v1102_v6  ;;  %v277_v14 = vsel %vm276_vm0, %v1101_v9, %v1106_v5  ;;  %v279_v15 = vsel %vm276_vm0, %v1106_v5, %v1101_v9  ;;  %962 = vmatpush1.bf16.msk.msra.mxu1 %vm912_vm14, %v961_v61  ;;  %v1640_v18 = vpop.permute.xlu0 %1144  ;;  %p1224_p8 = scmp.ne.s32.totalorder %s878_s27, %s1223_s30  ;;  %p1229_p10 = scmp.lt.s32.totalorder %s1223_s30, %s1223_s30 }
 0x2a4   :  { %v916_v16 = vpack.c.bf16 %v278_v13, %v277_v14  ;;  %v919_v17 = vpack.c.bf16 %v280_v3, %v279_v15  ;;  %v1110_v20 = vpop.permute.xlu1 %1109  ;;  %vm354_vm14 = vcmp.lt.s32.totalorder %v350_v25, 16  ;;  %v1147_v0 = vunpack.i.h.bf16 %v1640_v18 }
 0x2a5   :  { %v1112_v23 = vunpack.i.h.bf16 %v1110_v20  ;;  %v1111_v24 = vunpack.i.l.bf16 %v1110_v20  ;;  %v1146_v4 = vunpack.i.l.bf16 %v1640_v18  ;;  %p1230_p11 = por %p1229_p10, %p1228_p9 }
 0x2a6   :  { %917 = vmatprep.subr.msk.bf16.mxu0 %vm915_vm4, %v916_v16 }
 0x2a7   :  { %v613_v27 = vsel %vm276_vm0, %v1112_v23, %v1117_v21  ;;  %v615_v29 = vsel %vm276_vm0, %v1117_v21, %v1112_v23  ;;  %v612_v19 = vsel %vm276_vm0, %v1111_v24, %v1116_v22  ;;  %v614_v28 = vsel %vm276_vm0, %v1116_v22, %v1111_v24  ;;  %920 = vmatpush1.bf16.msk.msra.mxu0 %vm918_vm11, %v919_v17  ;;  %v1689_v44 = vpop.permute.xlu0 %1154  ;;  %p1231_p12 = pnand %p1230_p11, %p1224_p8 }
 0x2a8   :  { %v964_v1 = vpack.c.bf16 %v613_v27, %v612_v19  ;;  %v967_v2 = vpack.c.bf16 %v615_v29, %v614_v28  ;;  %v1120_v30 = vpop.permute.xlu1 %1119  ;;  %778 = vmatprep.subr.bf16.mxu0 %v304_v48  ;;  %vm353_vm0 = vcmp.lt.s32.totalorder %v349_v26, 16  ;;  %v1157_v3 = vunpack.i.h.bf16 %v1689_v44 }
 0x2a9   :  { %v1122_v34 = vunpack.i.h.bf16 %v1120_v30  ;;  %v1121_v35 = vunpack.i.l.bf16 %v1120_v30  ;;  %vm1736_vm3 = vmand %vm351_vm7, %vm353_vm0  ;;  %v1156_v14 = vunpack.i.l.bf16 %v1689_v44  ;;  %vm410_vm7 = vcmp.lt.s32.totalorder %v1382_v63, 111 }
 0x2aa   :  { %965 = vmatprep.subr.msk.bf16.mxu1 %vm915_vm4, %v964_v1  ;;  %vm1725_vm4 = vmand %vm352_vm5, %vm354_vm14 }
 0x2ab   :  { %v317_v48 = vsel %vm315_vm9, %v1122_v34, %v1127_v10  ;;  %v319_v32 = vsel %vm315_vm9, %v1127_v10, %v1122_v34  ;;  %v316_v36 = vsel %vm315_vm9, %v1121_v35, %v1126_v33  ;;  %v318_v37 = vsel %vm315_vm9, %v1126_v33, %v1121_v35  ;;  %779 = vmatpush1.bf16.msra.mxu0 %v303_v49  ;;  %v1165_v55 = vpop.permute.xlu0 %1164  ;;  %vm1771_vm5 = vmand %vm1736_vm3, %vm180_vm8 }
 0x2ac   :  { %v922_v39 = vpack.c.bf16 %v319_v32, %v318_v37  ;;  %v925_v42 = vpack.c.bf16 %v317_v48, %v316_v36  ;;  %968 = vmatpush1.bf16.msk.msra.mxu1 %vm918_vm11, %v967_v2  ;;  %v1130_v11 = vpop.permute.xlu1 %1129  ;;  %vm344_vm11 = vcmp.lt.s32.totalorder %v1382_v63, 113  ;;  %vm930_vm8 = vmpackc.low %vm1771_vm5, %vm1771_vm5  ;;  %v1167_v26 = vunpack.i.h.bf16 %v1165_v55 }
 0x2ad   :  { %v1132_v49 = vunpack.i.h.bf16 %v1130_v11  ;;  %v1131_v38 = vunpack.i.l.bf16 %v1130_v11  ;;  %821 = vmatprep.subr.bf16.mxu1 %v625_v57  ;;  %v1166_v27 = vunpack.i.l.bf16 %v1165_v55  ;;  %vm933_vm13 = vmpackc.low %vm1725_vm4, %vm1725_vm4 }
 0x2ae   :  { %923 = vmatprep.subr.msk.bf16.mxu0 %vm921_vm15, %v922_v39  ;;  %vm936_vm14 = vmpackc.low %vm1736_vm3, %vm1736_vm3 }
 0x2af   :  { %v637_v52 = vsel %vm315_vm9, %v1132_v49, %v1137_v40  ;;  %v639_v54 = vsel %vm315_vm9, %v1137_v40, %v1132_v49  ;;  %v636_v57 = vsel %vm315_vm9, %v1131_v38, %v1136_v43  ;;  %v638_v50 = vsel %vm315_vm9, %v1136_v43, %v1131_v38  ;;  %926 = vmatpush1.bf16.msk.msra.mxu0 %vm924_vm10, %v925_v42  ;;  %vm1761_vm9 = vmand %vm1725_vm4, %vm181_vm6  ;;  %v1175_v17 = vpop.permute.xlu0 %1174 }
 0x2b0   :  { %v970_v56 = vpack.c.bf16 %v639_v54, %v638_v50  ;;  %v973_v60 = vpack.c.bf16 %v637_v52, %v636_v57  ;;  %822 = vmatpush1.bf16.msra.mxu1 %v624_v58  ;;  %v1140_v61 = vpop.permute.xlu1 %1139  ;;  %vm927_vm6 = vmpackc.low %vm1761_vm9, %vm1761_vm9  ;;  %v1177_v35 = vunpack.i.h.bf16 %v1175_v17  ;;  %v1176_v41 = vunpack.i.l.bf16 %v1175_v17 }
 0x2b1   :  { %v1142_v5 = vunpack.i.h.bf16 %v1140_v61  ;;  %v1141_v6 = vunpack.i.l.bf16 %v1140_v61  ;;  %vm1867_vm0 = vmand %vm1725_vm4, %vm253_vm1 }
 0x2b2   :  { %971 = vmatprep.subr.msk.bf16.mxu1 %vm921_vm15, %v970_v56  ;;  %vm1875_vm15 = vmand %vm1736_vm3, %vm252_vm2 }
 0x2b3   :  { %v346_v53 = vsel %vm344_vm11, %v1142_v5, %v1147_v0  ;;  %v348_v58 = vsel %vm344_vm11, %v1147_v0, %v1142_v5  ;;  %v345_v7 = vsel %vm344_vm11, %v1141_v6, %v1146_v4  ;;  %v347_v8 = vsel %vm344_vm11, %v1146_v4, %v1141_v6  ;;  %v1185_v31 = vpop.permute.xlu0 %1184  ;;  %vm939_vm1 = vmpackc.low %vm1867_vm0, %vm1867_vm0 }
 0x2b4   :  { %v928_v9 = vpack.c.bf16 %v348_v58, %v347_v8  ;;  %v931_v12 = vpack.c.bf16 %v346_v53, %v345_v7  ;;  %974 = vmatpush1.bf16.msk.msra.mxu1 %vm924_vm10, %v973_v60  ;;  %v1150_v13 = vpop.permute.xlu1 %1149  ;;  %v1187_v49 = vunpack.i.h.bf16 %v1185_v31  ;;  %v1186_v38 = vunpack.i.l.bf16 %v1185_v31  ;;  %vm942_vm2 = vmpackc.low %vm1875_vm15, %vm1875_vm15 }
 0x2b5   :  { %v1152_v15 = vunpack.i.h.bf16 %v1150_v13  ;;  %v1151_v16 = vunpack.i.l.bf16 %v1150_v13 }
 0x2b6   :  { %929 = vmatprep.subr.msk.bf16.mxu0 %vm927_vm6, %v928_v9 }
 0x2b7   :  { %v657_v18 = vsel %vm344_vm11, %v1152_v15, %v1157_v3  ;;  %v659_v20 = vsel %vm344_vm11, %v1157_v3, %v1152_v15  ;;  %v656_v21 = vsel %vm344_vm11, %v1151_v16, %v1156_v14  ;;  %v658_v22 = vsel %vm344_vm11, %v1156_v14, %v1151_v16  ;;  %932 = vmatpush1.bf16.msk.msra.mxu0 %vm930_vm8, %v931_v12  ;;  %v1195_v50 = vpop.permute.xlu0 %1194 }
 0x2b8   :  { %v976_v23 = vpack.c.bf16 %v659_v20, %v658_v22  ;;  %v979_v24 = vpack.c.bf16 %v657_v18, %v656_v21  ;;  %v1160_v25 = vpop.permute.xlu1 %1159  ;;  %v1197_v62 = vunpack.i.h.bf16 %v1195_v50  ;;  %v1196_v0 = vunpack.i.l.bf16 %v1195_v50 }
 0x2b9   :  { %v1162_v29 = vunpack.i.h.bf16 %v1160_v25  ;;  %v1161_v19 = vunpack.i.l.bf16 %v1160_v25 }
 0x2ba   :  { %977 = vmatprep.subr.msk.bf16.mxu1 %vm927_vm6, %v976_v23 }
 0x2bb   :  { %v383_v28 = vsel %vm381_vm12, %v1162_v29, %v1167_v26  ;;  %v385_v1 = vsel %vm381_vm12, %v1167_v26, %v1162_v29  ;;  %v382_v2 = vsel %vm381_vm12, %v1161_v19, %v1166_v27  ;;  %v384_v30 = vsel %vm381_vm12, %v1166_v27, %v1161_v19  ;;  %980 = vmatpush1.bf16.msk.msra.mxu1 %vm930_vm8, %v979_v24 }
 0x2bc   :  { %v934_v10 = vpack.c.bf16 %v385_v1, %v384_v30  ;;  %v937_v33 = vpack.c.bf16 %v383_v28, %v382_v2  ;;  %v1170_v34 = vpop.permute.xlu1 %1169 }
 0x2bd   :  { %v1172_v44 = vunpack.i.h.bf16 %v1170_v34  ;;  %v1171_v48 = vunpack.i.l.bf16 %v1170_v34 }
 0x2be   :  { %935 = vmatprep.subr.msk.bf16.mxu0 %vm933_vm13, %v934_v10 }
 0x2bf   :  { %v677_v32 = vsel %vm381_vm12, %v1172_v44, %v1177_v35  ;;  %v679_v36 = vsel %vm381_vm12, %v1177_v35, %v1172_v44  ;;  %v676_v37 = vsel %vm381_vm12, %v1171_v48, %v1176_v41  ;;  %v678_v39 = vsel %vm381_vm12, %v1176_v41, %v1171_v48  ;;  %938 = vmatpush1.bf16.msk.msra.mxu0 %vm936_vm14, %v937_v33 }
 0x2c0   :  { %v982_v42 = vpack.c.bf16 %v679_v36, %v678_v39  ;;  %v985_v11 = vpack.c.bf16 %v677_v32, %v676_v37  ;;  %v1180_v40 = vpop.permute.xlu1 %1179 }
 0x2c1   :  { %v1182_v52 = vunpack.i.h.bf16 %v1180_v40  ;;  %v1181_v54 = vunpack.i.l.bf16 %v1180_v40 }
 0x2c2   :  { %983 = vmatprep.subr.msk.bf16.mxu1 %vm933_vm13, %v982_v42 }
 0x2c3   :  { %v412_v46 = vsel %vm410_vm7, %v1182_v52, %v1187_v49  ;;  %v414_v55 = vsel %vm410_vm7, %v1187_v49, %v1182_v52  ;;  %v411_v59 = vsel %vm410_vm7, %v1181_v54, %v1186_v38  ;;  %v413_v56 = vsel %vm410_vm7, %v1186_v38, %v1181_v54  ;;  %986 = vmatpush1.bf16.msk.msra.mxu1 %vm936_vm14, %v985_v11 }
 0x2c4   :  { %v940_v45 = vpack.c.bf16 %v414_v55, %v413_v56  ;;  %v943_v60 = vpack.c.bf16 %v412_v46, %v411_v59  ;;  %v1190_v61 = vpop.permute.xlu1 %1189 }
 0x2c5   :  { %v1192_v4 = vunpack.i.h.bf16 %v1190_v61  ;;  %v1191_v5 = vunpack.i.l.bf16 %v1190_v61 }
 0x2c6   :  { %941 = vmatprep.subr.msk.bf16.mxu0 %vm939_vm1, %v940_v45 }
 0x2c7   :  { %v697_v6 = vsel %vm410_vm7, %v1192_v4, %v1197_v62  ;;  %v699_v51 = vsel %vm410_vm7, %v1197_v62, %v1192_v4  ;;  %v696_v53 = vsel %vm410_vm7, %v1191_v5, %v1196_v0  ;;  %v698_v58 = vsel %vm410_vm7, %v1196_v0, %v1191_v5  ;;  %944 = vmatpush1.bf16.msk.msra.mxu0 %vm942_vm2, %v943_v60 }
 0x2c8   :  { %v988_v7 = vpack.c.bf16 %v699_v51, %v698_v58  ;;  %v991_v8 = vpack.c.bf16 %v697_v6, %v696_v53  ;;  %v756_v3 = vpop.permute.xlu0 %755 }
 0x2ca   :  { %803 = vmatmul.mubr.bf16.vlgmr.msra.gmra.mrb[4].mxu0 %v1200_v47  ;;  %989 = vmatprep.subr.msk.bf16.mxu1 %vm939_vm1, %v988_v7 }
 0x2cb   :  { %992 = vmatpush1.bf16.msk.msra.mxu1 %vm942_vm2, %v991_v8 }
 0x2ce   :  { %846 = vmatmul.mubr.bf16.vlgmr.msra.gmra.mrb[4].mxu1 %v1200_v47 }
 0x2d5   :  { %v751_v63 = vpop.permute.xlu1 %750 }
 0x39d   :  { %v804_v9 = vpop.f32.mrb[4].mxu0 }
 0x39e   :  { %v805_v12 = vadd.f32 %v804_v9, %v751_v63  ;;  %v806_v13 = vpop.f32.mrb[5].mxu0 }
 0x39f   :  { %v807_v14 = vadd.f32 %v806_v13, %v751_v63  ;;  %v808_v15 = vpop.f32.mrb[6].mxu0 }
 0x3a0   :  { %v856_v16 = vmax.f32 %v805_v12, 0.0  ;;  %v809_v17 = vadd.f32 %v808_v15, %v756_v3  ;;  %v810_v18 = vpop.f32.mrb[7].mxu0 }
 0x3a1   :  { %v857_v20 = vmax.f32 %v807_v14, 0.0  ;;  %v811_v21 = vadd.f32 %v810_v18, %v756_v3  ;;  %v847_v22 = vpop.f32.mrb[4].mxu1 }
 0x3a2   :  { %864 = vst [vmem:[#allocation6] sm:$0xff] %v856_v16  ;;  %v860_v23 = vmax.f32 %v809_v17, 0.0  ;;  %v848_v24 = vadd.f32 %v847_v22, %v751_v63  ;;  %v849_v25 = vpop.f32.mrb[5].mxu1 }
 0x3a3   :  { %865 = vst [vmem:[#allocation6 + $0x8] sm:$0xff] %v857_v20  ;;  %v861_v26 = vmax.f32 %v811_v21, 0.0  ;;  %v850_v27 = vadd.f32 %v849_v25, %v751_v63  ;;  %v851_v29 = vpop.f32.mrb[6].mxu1 }
 0x3a4   :  { %868 = vst [vmem:[#allocation6 + $0x20] sm:$0xff] %v860_v23  ;;  %v858_v19 = vmax.f32 %v848_v24, 0.0  ;;  %v852_v28 = vadd.f32 %v851_v29, %v756_v3  ;;  %v853_v1 = vpop.f32.mrb[7].mxu1 }
 0x3a5   :  { %869 = vst [vmem:[#allocation6 + $0x28] sm:$0xff] %v861_v26  ;;  %v859_v2 = vmax.f32 %v850_v27, 0.0  ;;  %v854_v30 = vadd.f32 %v853_v1, %v756_v3 }
 0x3a6   :  { %866 = vst [vmem:[#allocation6 + $0x10] sm:$0xff] %v858_v19  ;;  %v862_v31 = vmax.f32 %v852_v28, 0.0 }
 0x3a7   :  { %867 = vst [vmem:[#allocation6 + $0x18] sm:$0xff] %v859_v2  ;;  %v863_v10 = vmax.f32 %v854_v30, 0.0 }
 0x3a8   :  { %870 = vst [vmem:[#allocation6 + $0x30] sm:$0xff] %v862_v31 }
 0x3a9   :  { %871 = vst [vmem:[#allocation6 + $0x38] sm:$0xff] %v863_v10 }
 0x3aa   :  { %1234 = shalt.err (!%p1231_p12)
}
 0x3ab   :  { %s1235_s7 = scalar_lea.hbm %s1954_s5, 1024 }
 0x3ac   :  { %p1236_p13 = scmp.ne.s32.totalorder %s1954_s5, %s1235_s7  ;;  %p1239_p0 = scmp.lt.u32.totalorder %s1235_s7, %s1954_s5 }
 0x3ae   :  { %p1241_p1 = pnand %p1239_p0, %p1236_p13 }
 0x3b0   :  { %1244 = shalt.err (!%p1241_p1)
}
 0x3b1   :  { %883 = dma.vmem_to_hbm [thread:$0]  %s878_s27, 1024, %s1954_s5, [#allocation5], %s1250_s28, %s1250_s28, %s1251_s29  }
 0x3b2   :  { %1247 = dma.done.wait [#allocation5], 1024  }
 0x3b3   :  { %1248 = vsyncadd [#allocation5], 4294966272 }
 0x3b4   :  { %887 = vsyncpa [#allocation4], 1 }
 0x3b5   :  { %888 = vsyncpa [#allocation5], 1 }

</bundles_post_ra>
